<compile_context>
chip_gen: v7x
topology: tpu7x:2x2x1
jax: 0.10.0
libtpu: 0.0.40
codegen_flags: <defaults>
</compile_context>

<pallas_src>
import numpy as np
import jax
import jax.numpy as jnp
from jax.experimental import pallas as pl
from jax.experimental.pallas import tpu as pltpu


# ----------------------------------------------------------------------------
# align_corners=True bilinear interpolation matrix (out_size x in_size)
# ----------------------------------------------------------------------------
def _bilinear_matrix(in_size, out_size):
    A = np.zeros((out_size, in_size), dtype=np.float32)
    if out_size == 1:
        A[0, 0] = 1.0
        return A
    scale = (in_size - 1) / (out_size - 1)
    for i in range(out_size):
        src = i * scale
        i0 = min(int(np.floor(src)), in_size - 1)
        i1 = min(i0 + 1, in_size - 1)
        frac = src - i0
        A[i, i0] += 1.0 - frac
        A[i, i1] += frac
    return A


# ----------------------------------------------------------------------------
# Parameters (deterministic synthetic init); inference-mode BatchNorm folded
# into the 1x1 conv weights/biases (exactly what the PyTorch module computes
# in eval mode).
# ----------------------------------------------------------------------------
def _fold_bn(w, gamma, beta, mean, var, eps=1e-5):
    scale = gamma / jnp.sqrt(var + eps)          # per output channel
    return w * scale[None, :], beta - mean * scale


def init_params(key, num_classes):
    ks = jax.random.split(key, 10)

    def conv_w(k, cin, cout):
        return 0.05 * jax.random.normal(k, (cin, cout), jnp.float32)

    def bn(k, c):
        k1, k2, k3, k4 = jax.random.split(k, 4)
        gamma = 1.0 + 0.1 * jax.random.normal(k1, (c,), jnp.float32)
        beta = 0.05 * jax.random.normal(k2, (c,), jnp.float32)
        mean = 0.1 * jax.random.normal(k3, (c,), jnp.float32)
        var = 1.0 + 0.1 * jnp.abs(jax.random.normal(k4, (c,), jnp.float32))
        return gamma, beta, mean, var

    w1, b1 = _fold_bn(conv_w(ks[0], 512, 256), *bn(ks[1], 256))
    w2, b2 = _fold_bn(conv_w(ks[2], 256, 48), *bn(ks[3], 48))
    w3a, b3a = _fold_bn(conv_w(ks[4], 304, 256), *bn(ks[5], 256))
    w3b, b3b = _fold_bn(conv_w(ks[6], 256, 256), *bn(ks[7], 256))
    w4 = conv_w(ks[8], 256, num_classes)
    b4 = 0.05 * jax.random.normal(ks[9], (num_classes,), jnp.float32)
    return dict(w1=w1, b1=b1, w2=w2, b2=b2, w3a=w3a, b3a=b3a,
                w3b=w3b, b3b=b3b, w4=w4, b4=b4)


# ----------------------------------------------------------------------------
# Fused Pallas kernel: one grid step == one batch element, everything in VMEM.
# ----------------------------------------------------------------------------
def _decoder_kernel(xt_ref, xl_ref, w1_ref, b1_ref, a2d_ref,
                    w3hi_ref, w2f_ref, b3a_ref, w3b_ref, b3b_ref,
                    w4_ref, b4_ref, seg_ref, x_ref):
    f32 = jnp.float32
    bf16 = jnp.bfloat16

    # conv1 + BN (1x1 conv == matmul over channels): (HtWt, 512) @ (512, 256)
    x1 = jnp.dot(xt_ref[0], w1_ref[...], preferred_element_type=f32) + b1_ref[...]

    # F.interpolate(mode='bilinear', align_corners=True) as ONE matmul against
    # the Kronecker matrix kron(Ah, Aw): (HW, HtWt) @ (HtWt, 256), f32.
    xt_up = jnp.dot(a2d_ref[...], x1, preferred_element_type=f32)

    # concat + conv3a + BN, with conv2+BN folded into the low-48 rows of w3a:
    #   cat([xt_up, xl2]) @ w3a == xt_up @ w3a[:256] + (xl @ w2) @ w3a[256:]
    x3a = (jnp.dot(xt_up.astype(bf16), w3hi_ref[...], preferred_element_type=f32)
           + jnp.dot(xl_ref[0], w2f_ref[...], preferred_element_type=f32)
           + b3a_ref[...])

    # conv3b + BN
    x3 = (jnp.dot(x3a.astype(bf16), w3b_ref[...], preferred_element_type=f32)
          + b3b_ref[...])
    x_ref[0] = x3.astype(x_ref.dtype)

    # conv4 (with bias); output channels padded to a lane-dense 128 multiple
    seg_ref[0] = (jnp.dot(x3.astype(bf16), w4_ref[...], preferred_element_type=f32)
                  + b4_ref[...]).astype(seg_ref.dtype)


@jax.jit
def decoder_forward(params, xt_nchw, xl_nchw):
    f32, bf16 = jnp.float32, jnp.bfloat16
    N, Ct, ht, wt = xt_nchw.shape
    _, Cl, h, w = xl_nchw.shape
    C1 = params["w1"].shape[1]                       # 256
    nc = params["w4"].shape[1]                       # num_classes

    # NCHW -> (N, H*W, C); bf16 MXU operands (f32 accumulation in-kernel).
    xt = jnp.transpose(xt_nchw, (0, 2, 3, 1)).reshape(N, ht * wt, Ct).astype(bf16)
    xl = jnp.transpose(xl_nchw, (0, 2, 3, 1)).reshape(N, h * w, Cl).astype(bf16)

    # Compile-time constant interpolation matrix (f32 for accuracy; tiny).
    a2d = jnp.asarray(np.kron(_bilinear_matrix(ht, h), _bilinear_matrix(wt, w)))

    # Fold conv2+BN into the xl rows of conv3a (the path is purely linear).
    w3a_hi = params["w3a"][:C1]                                   # (256, 256)
    w3a_lo = params["w3a"][C1:]                                   # (48, 256)
    w2f = jnp.dot(params["w2"], w3a_lo)                           # (256, 256)
    b3a_t = params["b3a"] + jnp.dot(params["b2"], w3a_lo)         # (256,)

    # Pad conv4 to a lane-dense output width (unmasked vst), slice afterwards.
    ncp = max(128, ((nc + 127) // 128) * 128)
    w4p = jnp.zeros((C1, ncp), f32).at[:, :nc].set(params["w4"])
    b4p = jnp.zeros((ncp,), f32).at[:nc].set(params["b4"])

    def full(shape):                                   # whole-array block
        return pl.BlockSpec(shape, lambda n: (0,) * len(shape))

    seg_pad, x_out = pl.pallas_call(
        _decoder_kernel,
        out_shape=(jax.ShapeDtypeStruct((N, h * w, ncp), f32),
                   jax.ShapeDtypeStruct((N, h * w, C1), f32)),
        grid_spec=pltpu.PrefetchScalarGridSpec(
            num_scalar_prefetch=0,
            grid=(N,),                                 # one batch element / step
            in_specs=[
                pl.BlockSpec((1, ht * wt, Ct), lambda n: (n, 0, 0)),   # xt
                pl.BlockSpec((1, h * w, Cl), lambda n: (n, 0, 0)),     # xl
                full((Ct, C1)),            # w1  (BN folded)
                full((1, C1)),             # b1
                full((h * w, ht * wt)),    # a2d (Kronecker resize matrix)
                full((C1, C1)),            # w3a[:256]
                full((C1, C1)),            # w2f = w2 @ w3a[256:]
                full((1, C1)),             # b3a + b2 @ w3a[256:]
                full((C1, C1)),            # w3b
                full((1, C1)),             # b3b
                full((C1, ncp)),           # w4  (lane-padded)
                full((1, ncp)),            # b4  (lane-padded)
            ],
            out_specs=(pl.BlockSpec((1, h * w, ncp), lambda n: (n, 0, 0)),
                       pl.BlockSpec((1, h * w, C1), lambda n: (n, 0, 0))),
        ),
        compiler_params=pltpu.CompilerParams(
            dimension_semantics=("parallel",)),        # v7x: shard batch on 2 TCs
    )(xt, xl,
      params["w1"].astype(bf16), params["b1"].reshape(1, C1),
      a2d,
      w3a_hi.astype(bf16), w2f.astype(bf16), b3a_t.reshape(1, C1),
      params["w3b"].astype(bf16), params["b3b"].reshape(1, C1),
      w4p.astype(bf16), b4p.reshape(1, ncp))

    seg = jnp.transpose(seg_pad[:, :, :nc].reshape(N, h, w, nc), (0, 3, 1, 2))
    x = jnp.transpose(x_out.reshape(N, h, w, C1), (0, 3, 1, 2))
    return seg, x


# ----------------------------------------------------------------------------
# Pure-JAX f32 reference: the ORIGINAL unfused op order (conv1, bilinear,
# conv2, concat, conv3a, conv3b, conv4) so it also validates the conv2 folding
# and the Kronecker-matrix resize used by the kernel.
# ----------------------------------------------------------------------------
def decoder_forward_ref(params, xt_nchw, xl_nchw):
    hp = jax.lax.Precision.HIGHEST
    xt = jnp.transpose(xt_nchw, (0, 2, 3, 1))        # (N, ht, wt, 512)
    xl = jnp.transpose(xl_nchw, (0, 2, 3, 1))        # (N, h,  w,  256)
    _, ht, wt, _ = xt.shape
    _, h, w, _ = xl.shape

    x1 = jnp.einsum('nijc,cd->nijd', xt, params["w1"], precision=hp) + params["b1"]
    Ah = jnp.asarray(_bilinear_matrix(ht, h))
    Aw = jnp.asarray(_bilinear_matrix(wt, w))
    xt_up = jnp.einsum('hi,wj,nijc->nhwc', Ah, Aw, x1, precision=hp)

    xl2 = jnp.einsum('nhwc,cd->nhwd', xl, params["w2"], precision=hp) + params["b2"]
    xcat = jnp.concatenate([xt_up, xl2], axis=-1)
    x3 = jnp.einsum('nhwc,cd->nhwd', xcat, params["w3a"], precision=hp) + params["b3a"]
    x3 = jnp.einsum('nhwc,cd->nhwd', x3, params["w3b"], precision=hp) + params["b3b"]
    seg = jnp.einsum('nhwc,cd->nhwd', x3, params["w4"], precision=hp) + params["b4"]
    return (jnp.transpose(seg, (0, 3, 1, 2)), jnp.transpose(x3, (0, 3, 1, 2)))


if __name__ == "__main__":
    key = jax.random.PRNGKey(0)
    kp, kxt, kxl = jax.random.split(key, 3)

    num_classes = 16
    params = init_params(kp, num_classes)

    # xt: deep features (512 ch, 8x8); xl: low-level features (256 ch, 16x16)
    xt = jax.random.normal(kxt, (2, 512, 8, 8), jnp.float32)
    xl = jax.random.normal(kxl, (2, 256, 16, 16), jnp.float32)

    seg, x = decoder_forward(params, xt, xl)
    seg = jax.block_until_ready(seg)
    x = jax.block_until_ready(x)

    assert seg.shape == (2, num_classes, 16, 16)
    assert x.shape == (2, 256, 16, 16)

    # bf16 MXU operands (f32 accumulation) vs an f32-HIGHEST reference:
    # chained-matmul rounding error is ~0.3% rms, so 2e-2 tolerances are ample.
    seg_ref, x_ref = decoder_forward_ref(params, xt, xl)
    np.testing.assert_allclose(np.asarray(seg), np.asarray(seg_ref),
                               rtol=2e-2, atol=2e-2)
    np.testing.assert_allclose(np.asarray(x), np.asarray(x_ref),
                               rtol=2e-2, atol=2e-2)

    print("KERNEL_OK")
</pallas_src>

<mosaic_0001>
module attributes {stable_mosaic.version = 11 : i64} {
  func.func @_decoder_kernel(%arg0: i32, %arg1: memref<1x64x512xbf16, #tpu.memory_space<vmem>>, %arg2: memref<1x256x256xbf16, #tpu.memory_space<vmem>>, %arg3: memref<512x256xbf16, #tpu.memory_space<vmem>>, %arg4: memref<1x256xf32, #tpu.memory_space<vmem>>, %arg5: memref<256x64xf32, #tpu.memory_space<vmem>>, %arg6: memref<256x256xbf16, #tpu.memory_space<vmem>>, %arg7: memref<256x256xbf16, #tpu.memory_space<vmem>>, %arg8: memref<1x256xf32, #tpu.memory_space<vmem>>, %arg9: memref<256x256xbf16, #tpu.memory_space<vmem>>, %arg10: memref<1x256xf32, #tpu.memory_space<vmem>>, %arg11: memref<256x128xbf16, #tpu.memory_space<vmem>>, %arg12: memref<1x128xf32, #tpu.memory_space<vmem>>, %arg13: memref<1x256x128xf32, #tpu.memory_space<vmem>>, %arg14: memref<1x256x256xf32, #tpu.memory_space<vmem>>) attributes {dimension_semantics = [#tpu.dimension_semantics<parallel>], iteration_bounds = array<i64: 2>, scalar_prefetch = 0 : i64, scratch_operands = 0 : i64, tpu.core_type = #tpu.core_type<tc>, window_params = [{transform_indices = @transform_0, window_bounds = array<i64: 1, 64, 512>}, {transform_indices = @transform_1, window_bounds = array<i64: 1, 256, 256>}, {pipeline_mode = #tpu.pipeline_mode<synchronous>, transform_indices = @transform_2, window_bounds = array<i64: 512, 256>}, {pipeline_mode = #tpu.pipeline_mode<synchronous>, transform_indices = @transform_3, window_bounds = array<i64: 1, 256>}, {pipeline_mode = #tpu.pipeline_mode<synchronous>, transform_indices = @transform_4, window_bounds = array<i64: 256, 64>}, {pipeline_mode = #tpu.pipeline_mode<synchronous>, transform_indices = @transform_5, window_bounds = array<i64: 256, 256>}, {pipeline_mode = #tpu.pipeline_mode<synchronous>, transform_indices = @transform_6, window_bounds = array<i64: 256, 256>}, {pipeline_mode = #tpu.pipeline_mode<synchronous>, transform_indices = @transform_7, window_bounds = array<i64: 1, 256>}, {pipeline_mode = #tpu.pipeline_mode<synchronous>, transform_indices = @transform_8, window_bounds = array<i64: 256, 256>}, {pipeline_mode = #tpu.pipeline_mode<synchronous>, transform_indices = @transform_9, window_bounds = array<i64: 1, 256>}, {pipeline_mode = #tpu.pipeline_mode<synchronous>, transform_indices = @transform_10, window_bounds = array<i64: 256, 128>}, {pipeline_mode = #tpu.pipeline_mode<synchronous>, transform_indices = @transform_11, window_bounds = array<i64: 1, 128>}, {transform_indices = @transform_12, window_bounds = array<i64: 1, 256, 128>}, {transform_indices = @transform_13, window_bounds = array<i64: 1, 256, 256>}]} {
    %c0 = arith.constant 0 : index
    %c0_0 = arith.constant 0 : index
    %c0_1 = arith.constant 0 : index
    %0 = vector.load %arg1[%c0, %c0_0, %c0_1] : memref<1x64x512xbf16, #tpu.memory_space<vmem>>, vector<1x64x512xbf16>
    %1 = vector.shape_cast %0 : vector<1x64x512xbf16> to vector<64x512xbf16>
    %c0_2 = arith.constant 0 : index
    %c0_3 = arith.constant 0 : index
    %2 = vector.load %arg3[%c0_2, %c0_3] : memref<512x256xbf16, #tpu.memory_space<vmem>>, vector<512x256xbf16>
    %cst = arith.constant dense<0.000000e+00> : vector<64x256xf32>
    %3 = tpu.matmul %1, %2, %cst {dimension_numbers = #tpu.dot_dimension_numbers<[1], [0], [0], [1], [0, 0, 1, 1], [], []>} : vector<64x512xbf16>, vector<512x256xbf16>, vector<64x256xf32> -> vector<64x256xf32>
    %c0_4 = arith.constant 0 : index
    %c0_5 = arith.constant 0 : index
    %4 = vector.load %arg4[%c0_4, %c0_5] : memref<1x256xf32, #tpu.memory_space<vmem>>, vector<1x256xf32>
    %5 = vector.broadcast %4 : vector<1x256xf32> to vector<64x256xf32>
    %6 = arith.addf %3, %5 : vector<64x256xf32>
    %c0_6 = arith.constant 0 : index
    %c0_7 = arith.constant 0 : index
    %7 = vector.load %arg5[%c0_6, %c0_7] : memref<256x64xf32, #tpu.memory_space<vmem>>, vector<256x64xf32>
    %cst_8 = arith.constant dense<0.000000e+00> : vector<256x256xf32>
    %8 = tpu.matmul %7, %6, %cst_8 {dimension_numbers = #tpu.dot_dimension_numbers<[1], [0], [0], [1], [0, 0, 1, 1], [], []>} : vector<256x64xf32>, vector<64x256xf32>, vector<256x256xf32> -> vector<256x256xf32>
    %9 = arith.truncf %8 : vector<256x256xf32> to vector<256x256xbf16>
    %c0_9 = arith.constant 0 : index
    %c0_10 = arith.constant 0 : index
    %10 = vector.load %arg6[%c0_9, %c0_10] : memref<256x256xbf16, #tpu.memory_space<vmem>>, vector<256x256xbf16>
    %cst_11 = arith.constant dense<0.000000e+00> : vector<256x256xf32>
    %11 = tpu.matmul %9, %10, %cst_11 {dimension_numbers = #tpu.dot_dimension_numbers<[1], [0], [0], [1], [0, 0, 1, 1], [], []>} : vector<256x256xbf16>, vector<256x256xbf16>, vector<256x256xf32> -> vector<256x256xf32>
    %c0_12 = arith.constant 0 : index
    %c0_13 = arith.constant 0 : index
    %c0_14 = arith.constant 0 : index
    %12 = vector.load %arg2[%c0_12, %c0_13, %c0_14] : memref<1x256x256xbf16, #tpu.memory_space<vmem>>, vector<1x256x256xbf16>
    %13 = vector.shape_cast %12 : vector<1x256x256xbf16> to vector<256x256xbf16>
    %c0_15 = arith.constant 0 : index
    %c0_16 = arith.constant 0 : index
    %14 = vector.load %arg7[%c0_15, %c0_16] : memref<256x256xbf16, #tpu.memory_space<vmem>>, vector<256x256xbf16>
    %cst_17 = arith.constant dense<0.000000e+00> : vector<256x256xf32>
    %15 = tpu.matmul %13, %14, %cst_17 {dimension_numbers = #tpu.dot_dimension_numbers<[1], [0], [0], [1], [0, 0, 1, 1], [], []>} : vector<256x256xbf16>, vector<256x256xbf16>, vector<256x256xf32> -> vector<256x256xf32>
    %16 = arith.addf %11, %15 : vector<256x256xf32>
    %c0_18 = arith.constant 0 : index
    %c0_19 = arith.constant 0 : index
    %17 = vector.load %arg8[%c0_18, %c0_19] : memref<1x256xf32, #tpu.memory_space<vmem>>, vector<1x256xf32>
    %18 = vector.broadcast %17 : vector<1x256xf32> to vector<256x256xf32>
    %19 = arith.addf %16, %18 : vector<256x256xf32>
    %20 = arith.truncf %19 : vector<256x256xf32> to vector<256x256xbf16>
    %c0_20 = arith.constant 0 : index
    %c0_21 = arith.constant 0 : index
    %21 = vector.load %arg9[%c0_20, %c0_21] : memref<256x256xbf16, #tpu.memory_space<vmem>>, vector<256x256xbf16>
    %cst_22 = arith.constant dense<0.000000e+00> : vector<256x256xf32>
    %22 = tpu.matmul %20, %21, %cst_22 {dimension_numbers = #tpu.dot_dimension_numbers<[1], [0], [0], [1], [0, 0, 1, 1], [], []>} : vector<256x256xbf16>, vector<256x256xbf16>, vector<256x256xf32> -> vector<256x256xf32>
    %c0_23 = arith.constant 0 : index
    %c0_24 = arith.constant 0 : index
    %23 = vector.load %arg10[%c0_23, %c0_24] : memref<1x256xf32, #tpu.memory_space<vmem>>, vector<1x256xf32>
    %24 = vector.broadcast %23 : vector<1x256xf32> to vector<256x256xf32>
    %25 = arith.addf %22, %24 : vector<256x256xf32>
    %c0_25 = arith.constant 0 : index
    %c0_26 = arith.constant 0 : index
    %c0_27 = arith.constant 0 : index
    %26 = vector.load %arg14[%c0_25, %c0_26, %c0_27] : memref<1x256x256xf32, #tpu.memory_space<vmem>>, vector<1x256x256xf32>
    %27 = vector.shape_cast %26 : vector<1x256x256xf32> to vector<256x256xf32>
    %28 = vector.shape_cast %25 : vector<256x256xf32> to vector<1x256x256xf32>
    tpu.vector_store %arg14[%c0_25, %c0_26, %c0_27], %28 {strides = array<i32>} : memref<1x256x256xf32, #tpu.memory_space<vmem>>, vector<1x256x256xf32>,
    %29 = arith.truncf %25 : vector<256x256xf32> to vector<256x256xbf16>
    %c0_28 = arith.constant 0 : index
    %c0_29 = arith.constant 0 : index
    %30 = vector.load %arg11[%c0_28, %c0_29] : memref<256x128xbf16, #tpu.memory_space<vmem>>, vector<256x128xbf16>
    %cst_30 = arith.constant dense<0.000000e+00> : vector<256x128xf32>
    %31 = tpu.matmul %29, %30, %cst_30 {dimension_numbers = #tpu.dot_dimension_numbers<[1], [0], [0], [1], [0, 0, 1, 1], [], []>} : vector<256x256xbf16>, vector<256x128xbf16>, vector<256x128xf32> -> vector<256x128xf32>
    %c0_31 = arith.constant 0 : index
    %c0_32 = arith.constant 0 : index
    %32 = vector.load %arg12[%c0_31, %c0_32] : memref<1x128xf32, #tpu.memory_space<vmem>>, vector<1x128xf32>
    %33 = vector.broadcast %32 : vector<1x128xf32> to vector<256x128xf32>
    %34 = arith.addf %31, %33 : vector<256x128xf32>
    %c0_33 = arith.constant 0 : index
    %c0_34 = arith.constant 0 : index
    %c0_35 = arith.constant 0 : index
    %35 = vector.load %arg13[%c0_33, %c0_34, %c0_35] : memref<1x256x128xf32, #tpu.memory_space<vmem>>, vector<1x256x128xf32>
    %36 = vector.shape_cast %35 : vector<1x256x128xf32> to vector<256x128xf32>
    %37 = vector.shape_cast %34 : vector<256x128xf32> to vector<1x256x128xf32>
    tpu.vector_store %arg13[%c0_33, %c0_34, %c0_35], %37 {strides = array<i32>} : memref<1x256x128xf32, #tpu.memory_space<vmem>>, vector<1x256x128xf32>,
    return
  }
  func.func @transform_0(%arg0: i32) -> (i32, i32, i32) {
    %c0_i32 = arith.constant 0 : i32
    %c0_i32_0 = arith.constant 0 : i32
    %c0_i32_1 = arith.constant 0 : i32
    return %arg0, %c0_i32, %c0_i32_0 : i32, i32, i32
  }
  func.func @transform_1(%arg0: i32) -> (i32, i32, i32) {
    %c0_i32 = arith.constant 0 : i32
    %c0_i32_0 = arith.constant 0 : i32
    %c0_i32_1 = arith.constant 0 : i32
    return %arg0, %c0_i32, %c0_i32_0 : i32, i32, i32
  }
  func.func @transform_2(%arg0: i32) -> (i32, i32) {
    %c0_i32 = arith.constant 0 : i32
    %c0_i32_0 = arith.constant 0 : i32
    %c0_i32_1 = arith.constant 0 : i32
    return %c0_i32, %c0_i32_0 : i32, i32
  }
  func.func @transform_3(%arg0: i32) -> (i32, i32) {
    %c0_i32 = arith.constant 0 : i32
    %c0_i32_0 = arith.constant 0 : i32
    %c0_i32_1 = arith.constant 0 : i32
    return %c0_i32, %c0_i32_0 : i32, i32
  }
  func.func @transform_4(%arg0: i32) -> (i32, i32) {
    %c0_i32 = arith.constant 0 : i32
    %c0_i32_0 = arith.constant 0 : i32
    %c0_i32_1 = arith.constant 0 : i32
    return %c0_i32, %c0_i32_0 : i32, i32
  }
  func.func @transform_5(%arg0: i32) -> (i32, i32) {
    %c0_i32 = arith.constant 0 : i32
    %c0_i32_0 = arith.constant 0 : i32
    %c0_i32_1 = arith.constant 0 : i32
    return %c0_i32, %c0_i32_0 : i32, i32
  }
  func.func @transform_6(%arg0: i32) -> (i32, i32) {
    %c0_i32 = arith.constant 0 : i32
    %c0_i32_0 = arith.constant 0 : i32
    %c0_i32_1 = arith.constant 0 : i32
    return %c0_i32, %c0_i32_0 : i32, i32
  }
  func.func @transform_7(%arg0: i32) -> (i32, i32) {
    %c0_i32 = arith.constant 0 : i32
    %c0_i32_0 = arith.constant 0 : i32
    %c0_i32_1 = arith.constant 0 : i32
    return %c0_i32, %c0_i32_0 : i32, i32
  }
  func.func @transform_8(%arg0: i32) -> (i32, i32) {
    %c0_i32 = arith.constant 0 : i32
    %c0_i32_0 = arith.constant 0 : i32
    %c0_i32_1 = arith.constant 0 : i32
    return %c0_i32, %c0_i32_0 : i32, i32
  }
  func.func @transform_9(%arg0: i32) -> (i32, i32) {
    %c0_i32 = arith.constant 0 : i32
    %c0_i32_0 = arith.constant 0 : i32
    %c0_i32_1 = arith.constant 0 : i32
    return %c0_i32, %c0_i32_0 : i32, i32
  }
  func.func @transform_10(%arg0: i32) -> (i32, i32) {
    %c0_i32 = arith.constant 0 : i32
    %c0_i32_0 = arith.constant 0 : i32
    %c0_i32_1 = arith.constant 0 : i32
    return %c0_i32, %c0_i32_0 : i32, i32
  }
  func.func @transform_11(%arg0: i32) -> (i32, i32) {
    %c0_i32 = arith.constant 0 : i32
    %c0_i32_0 = arith.constant 0 : i32
    %c0_i32_1 = arith.constant 0 : i32
    return %c0_i32, %c0_i32_0 : i32, i32
  }
  func.func @transform_12(%arg0: i32) -> (i32, i32, i32) {
    %c0_i32 = arith.constant 0 : i32
    %c0_i32_0 = arith.constant 0 : i32
    %c0_i32_1 = arith.constant 0 : i32
    return %arg0, %c0_i32, %c0_i32_0 : i32, i32, i32
  }
  func.func @transform_13(%arg0: i32) -> (i32, i32, i32) {
    %c0_i32 = arith.constant 0 : i32
    %c0_i32_0 = arith.constant 0 : i32
    %c0_i32_1 = arith.constant 0 : i32
    return %arg0, %c0_i32, %c0_i32_0 : i32, i32, i32
  }
}

</mosaic_0001>

<bundles_post_ra>
// kernel: decoder_forward.1
= control target key start
LH: loop header
LB: loop body
LE: loop exit
PB: predicated region body
PF: predicated region fallthrough
CT: control target
= control target key end

     0   :  { %s5886_s0 = inlined_call_operand.vmem [shape: bf16[2,64,512], index: 0, kind: input, shape index: {}]   ;;  %s5887_s1 = inlined_call_operand.vmem [shape: bf16[2,256,256], index: 1, kind: input, shape index: {}]   ;;  %s5888_s2 = inlined_call_operand.vmem [shape: bf16[512,256], index: 2, kind: input, shape index: {}]   ;;  %s5889_s3 = inlined_call_operand.vmem [shape: f32[1,256], index: 3, kind: input, shape index: {}]   ;;  %s5890_s4 = inlined_call_operand.vmem [shape: f32[256,64], index: 4, kind: input, shape index: {}]   ;;  %s5891_s5 = inlined_call_operand.vmem [shape: bf16[256,256], index: 5, kind: input, shape index: {}]   ;;  %s5892_s6 = inlined_call_operand.vmem [shape: bf16[256,256], index: 6, kind: input, shape index: {}]   ;;  %s5893_s7 = inlined_call_operand.vmem [shape: f32[1,256], index: 7, kind: input, shape index: {}]   ;;  %s5894_s8 = inlined_call_operand.vmem [shape: bf16[256,256], index: 8, kind: input, shape index: {}]   ;;  %s5895_s9 = inlined_call_operand.vmem [shape: f32[1,256], index: 9, kind: input, shape index: {}]   ;;  %s5896_s10 = inlined_call_operand.vmem [shape: bf16[256,128], index: 10, kind: input, shape index: {}]   ;;  %s5897_s11 = inlined_call_operand.vmem [shape: f32[1,128], index: 11, kind: input, shape index: {}]   ;;  %s5898_s12 = inlined_call_operand.vmem [shape: f32[2,256,128], index: 12, kind: output, shape index: {0}]   ;;  %s5899_s13 = inlined_call_operand.hbm [shape: f32[2,256,256], index: 13, kind: output, shape index: {1}]  }
   0x1   :  { %5904 = sst [smem:[#allocation8_spill]] %s5886_s0 }
   0x2   :  { %19 = vsyncpa [#allocation3], 0 }
   0x3   :  { %21 = vsyncpa [#allocation3 + $0x1], 0  ;;  %s4582_s25 = smov 0   ;;  %s4584_s26 = smov 0  }
   0x4   :  { %s4586_s27 = smov 0   ;;  %s4588_s28 = smov 0  }
   0x5 LB: > { %5905 = sst [smem:[#allocation5_spill]] %s4502_s27  ;;  %s4603_s29 = sadd.s32 4294967295, %s4506_s28   ;;  %s4506_s28 = sphi %s4588_s28, %s5912_s28   ;;  %s4502_s27 = sphi %s4586_s27, %s5914_s27   ;;  %s4498_s26 = sphi %s4584_s26, %s5916_s26   ;;  %s4494_s25 = sphi %s4582_s25, %s5915_s25  }
   0x6   : > { %s3541_s30 = sadd.s32 4294967294, %s4506_s28   ;;  %s4607_s14 = sadd.s32 1, %s4506_s28  }
   0x7   : > { %5906 = sst [smem:[#allocation6_spill]] %s4607_s14  ;;  %s322_s15 = sadd.s32 1, %s4502_s27 }
   0x8   : > { %s319_s16 = ssub.s32 %s4506_s28, %s4607_s14  ;;  %p332_p0 = scmp.ne.s32.totalorder %s4502_s27, %s4498_s26 }
   0x9   : > { %p320_p1 = scmp.eq.s32.totalorder %s319_s16, 0  ;;  %p333_p2 = scmp.eq.s32.totalorder %s4603_s29, 1 }
   0xa   : > { %p338_p3 = scmp.ne.s32.totalorder %s4498_s26, %s4494_s25  ;;  %p339_p4 = scmp.eq.s32.totalorder %s3541_s30, 1 }
   0xb   : > { %s4618_s17 = scalar_select %p320_p1, %s4502_s27, %s322_s15  }
   0xc   : > { %p4620_p5 = por %p333_p2, %p332_p0  ;;  %p4624_p6 = por %p339_p4, %p338_p3 }
   0xd   : > { %5907 = sst [smem:[#allocation7_spill]] %s4618_s17  ;;  %p3544_p7 = scmp.ge.s32.totalorder %s4506_s28, 1 }
   0xe   : > { %p403_p8 = scmp.lt.s32.totalorder %s4506_s28, 3 }
  0x10   : > { %p404_p9 = pnand %p3544_p7, %p403_p8 }
  0x11   : > { %v4116_v0 = vld [vmem:[%s5888_s2 + $0x4] ss:$8 sps:$4 sm:$0xff] (!%p404_p9)   ;;  %v4118_v1 = vld [vmem:[%s5888_s2] ss:$8 sps:$4 sm:$0xff] (!%p404_p9)   ;;  %v4119_v2 = vld [vmem:[%s5888_s2 + $0x14] ss:$8 sps:$4 sm:$0xff] (!%p404_p9)  }
  0x12   : > { %407 = sbr.rel (%p404_p9) target bundleno = 1429 (0x595), region = 68  ;;  %965 = vmatprep.subr.bf16.mxu0 (!%p404_p9), %v4116_v0  ;;  %v4121_v3 = vld [vmem:[%s5888_s2 + $0x10] ss:$8 sps:$4 sm:$0xff] (!%p404_p9)   ;;  %v4122_v4 = vld [vmem:[%s5888_s2 + $0x24] ss:$8 sps:$4 sm:$0xff] (!%p404_p9)   ;;  %p457_p10 = scmp.lt.s32.totalorder (!%p404_p9), %s4603_s29, 1 }
  0x13   : > { %966 = vmatpush1.bf16.msra.mxu0 (!%p404_p9), %v4118_v1  ;;  %v4124_v5 = vld [vmem:[%s5888_s2 + $0x20] ss:$8 sps:$4 sm:$0xff] (!%p404_p9)   ;;  %v4125_v6 = vld [vmem:[%s5888_s2 + $0x34] ss:$8 sps:$4 sm:$0xff] (!%p404_p9)   ;;  %v4127_v7 = vld [vmem:[%s5888_s2 + $0x30] ss:$8 sps:$4 sm:$0xff] (!%p404_p9)  }
  0x14   : > { %967 = vmatprep.subr.bf16.mxu0 (!%p404_p9), %v4119_v2  ;;  %v4128_v8 = vld [vmem:[%s5888_s2 + $0x44] ss:$8 sps:$4 sm:$0xff] (!%p404_p9)   ;;  %v4130_v9 = vld [vmem:[%s5888_s2 + $0x40] ss:$8 sps:$4 sm:$0xff] (!%p404_p9)   ;;  %v4131_v10 = vld [vmem:[%s5888_s2 + $0x54] ss:$8 sps:$4 sm:$0xff] (!%p404_p9)  }
  0x15   : > { %v4133_v11 = vld [vmem:[%s5888_s2 + $0x50] ss:$8 sps:$4 sm:$0xff] (!%p404_p9)   ;;  %s5910_s0 = sld [smem:[#allocation8_spill]] (!%p404_p9)  ;;  %v4134_v12 = vld [vmem:[%s5888_s2 + $0x64] ss:$8 sps:$4 sm:$0xff] (!%p404_p9)   ;;  %vm1143_vm0 = vcmask (!%p404_p9), 523264  }
  0x16   : > { %v4136_v14 = vld [vmem:[%s5888_s2 + $0x60] ss:$8 sps:$4 sm:$0xff] (!%p404_p9)   ;;  %v4137_v15 = vld [vmem:[%s5888_s2 + $0x74] ss:$8 sps:$4 sm:$0xff] (!%p404_p9)   ;;  %v4139_v16 = vld [vmem:[%s5888_s2 + $0x70] ss:$8 sps:$4 sm:$0xff] (!%p404_p9)  }
  0x17   : > { %968 = vmatpush1.bf16.msra.mxu0 (!%p404_p9), %v4121_v3  ;;  %v4140_v17 = vld [vmem:[%s5888_s2 + $0x84] ss:$8 sps:$4 sm:$0xff] (!%p404_p9)   ;;  %v4142_v18 = vld [vmem:[%s5888_s2 + $0x80] ss:$8 sps:$4 sm:$0xff] (!%p404_p9)   ;;  %v4143_v19 = vld [vmem:[%s5888_s2 + $0x94] ss:$8 sps:$4 sm:$0xff] (!%p404_p9)  }
  0x18   : > { %969 = vmatprep.subr.bf16.mxu0 (!%p404_p9), %v4122_v4  ;;  %v4145_v20 = vld [vmem:[%s5888_s2 + $0x90] ss:$8 sps:$4 sm:$0xff] (!%p404_p9)   ;;  %v4146_v21 = vld [vmem:[%s5888_s2 + $0xa4] ss:$8 sps:$4 sm:$0xff] (!%p404_p9)   ;;  %v4148_v22 = vld [vmem:[%s5888_s2 + $0xa0] ss:$8 sps:$4 sm:$0xff] (!%p404_p9)  }
  0x19   : > { %s4659_s16 = scalar_select %p457_p10, %s4603_s29, 1  ;;  %v4149_v23 = vld [vmem:[%s5888_s2 + $0xb4] ss:$8 sps:$4 sm:$0xff]   ;;  %v4151_v24 = vld [vmem:[%s5888_s2 + $0xb0] ss:$8 sps:$4 sm:$0xff]  }
  0x1a   : > { %v4152_v25 = vld [vmem:[%s5888_s2 + $0xc4] ss:$8 sps:$4 sm:$0xff]   ;;  %v4154_v26 = vld [vmem:[%s5888_s2 + $0xc0] ss:$8 sps:$4 sm:$0xff]   ;;  %v4155_v27 = vld [vmem:[%s5888_s2 + $0xd4] ss:$8 sps:$4 sm:$0xff]  }
  0x1b   : > { %970 = vmatpush1.bf16.msra.mxu0 %v4124_v5  ;;  %s3814_s23 = sshll.u32 %s4659_s16, 7  ;;  %v4157_v28 = vld [vmem:[%s5888_s2 + $0xd0] ss:$8 sps:$4 sm:$0xff]   ;;  %v4158_v29 = vld [vmem:[%s5888_s2 + $0xe4] ss:$8 sps:$4 sm:$0xff]   ;;  %s454_s24 = sand.u32 1, %s4498_s26  }
  0x1c   : > { %971 = vmatprep.subr.bf16.mxu0 %v4125_v6  ;;  %s4674_s14 = scalar_lea.vmem %s5910_s0, %s3814_s23  ;;  %v4160_v30 = vld [vmem:[%s5888_s2 + $0xe0] ss:$8 sps:$4 sm:$0xff]   ;;  %v4161_v31 = vld [vmem:[%s5888_s2 + $0xf4] ss:$8 sps:$4 sm:$0xff]   ;;  %v4163_v32 = vld [vmem:[%s5888_s2 + $0xf0] ss:$8 sps:$4 sm:$0xff]  }
  0x1d   : > { %v4166_v13 = vld [vmem:[%s4674_s14 + $0x4] ss:$16 sps:$4 sm:$0xff]   ;;  %v4164_v34 = vld [vmem:[%s4674_s14] ss:$16 sps:$4 sm:$0xff]   ;;  %v4226_v54 = vld [vmem:[%s4674_s14 + $0xc] ss:$16 sps:$4 sm:$0xff]  }
  0x1e   : > { %997 = vmatprep.mubr.bf16.mxu0 %v4166_v13  ;;  %v4169_v33 = vld [vmem:[%s5888_s2 + $0x104] ss:$8 sps:$4 sm:$0xff]   ;;  %v4167_v35 = vld [vmem:[%s5888_s2 + $0x100] ss:$8 sps:$4 sm:$0xff]   ;;  %v4172_v37 = vld [vmem:[%s5888_s2 + $0x114] ss:$8 sps:$4 sm:$0xff]  }
  0x1f   : > { %972 = vmatpush1.bf16.msra.mxu0 %v4127_v7  ;;  %v4197_v36 = vld [vmem:[%s4674_s14 + $0x24] ss:$16 sps:$4 sm:$0xff]   ;;  %v4170_v38 = vld [vmem:[%s5888_s2 + $0x110] ss:$8 sps:$4 sm:$0xff]   ;;  %v4173_v41 = vld [vmem:[%s5888_s2 + $0x120] ss:$8 sps:$4 sm:$0xff]  }
  0x20   : > { %973 = vmatprep.subr.bf16.mxu0 %v4128_v8  ;;  %v4175_v39 = vld [vmem:[%s5888_s2 + $0x124] ss:$8 sps:$4 sm:$0xff]   ;;  %v4199_v40 = vld [vmem:[%s4674_s14 + $0x20] ss:$16 sps:$4 sm:$0xff]   ;;  %v4178_v43 = vld [vmem:[%s5888_s2 + $0x134] ss:$8 sps:$4 sm:$0xff]  }
  0x21   : > { %v4206_v42 = vld [vmem:[%s4674_s14 + $0x44] ss:$16 sps:$4 sm:$0xff]   ;;  %v4176_v44 = vld [vmem:[%s5888_s2 + $0x130] ss:$8 sps:$4 sm:$0xff]   ;;  %v4179_v47 = vld [vmem:[%s5888_s2 + $0x140] ss:$8 sps:$4 sm:$0xff]  }
  0x22   : > { %v4181_v45 = vld [vmem:[%s5888_s2 + $0x144] ss:$8 sps:$4 sm:$0xff]   ;;  %v4208_v46 = vld [vmem:[%s4674_s14 + $0x40] ss:$16 sps:$4 sm:$0xff]   ;;  %v4184_v49 = vld [vmem:[%s5888_s2 + $0x154] ss:$8 sps:$4 sm:$0xff]  }
  0x23   : > { %974 = vmatpush1.bf16.msra.mxu0 %v4130_v9  ;;  %v4215_v48 = vld [vmem:[%s4674_s14 + $0x64] ss:$16 sps:$4 sm:$0xff]   ;;  %v4182_v50 = vld [vmem:[%s5888_s2 + $0x150] ss:$8 sps:$4 sm:$0xff]   ;;  %v4185_v53 = vld [vmem:[%s5888_s2 + $0x160] ss:$8 sps:$4 sm:$0xff]  }
  0x24   : > { %975 = vmatprep.subr.bf16.mxu0 %v4131_v10  ;;  %v4187_v51 = vld [vmem:[%s5888_s2 + $0x164] ss:$8 sps:$4 sm:$0xff]   ;;  %v4217_v52 = vld [vmem:[%s4674_s14 + $0x60] ss:$16 sps:$4 sm:$0xff]   ;;  %v4190_v55 = vld [vmem:[%s5888_s2 + $0x174] ss:$8 sps:$4 sm:$0xff]  }
  0x25   : > { %v4188_v56 = vld [vmem:[%s5888_s2 + $0x170] ss:$8 sps:$4 sm:$0xff]   ;;  %v4193_v57 = vld [vmem:[%s5888_s2 + $0x184] ss:$8 sps:$4 sm:$0xff]   ;;  %v4191_v58 = vld [vmem:[%s5888_s2 + $0x180] ss:$8 sps:$4 sm:$0xff]  }
  0x26   : > { %v4196_v59 = vld [vmem:[%s5888_s2 + $0x194] ss:$8 sps:$4 sm:$0xff]   ;;  %v4194_v60 = vld [vmem:[%s5888_s2 + $0x190] ss:$8 sps:$4 sm:$0xff]   ;;  %v4202_v61 = vld [vmem:[%s5888_s2 + $0x1a4] ss:$8 sps:$4 sm:$0xff]  }
  0x27   : > { %976 = vmatpush1.bf16.msra.mxu0 %v4133_v11  ;;  %v4200_v62 = vld [vmem:[%s5888_s2 + $0x1a0] ss:$8 sps:$4 sm:$0xff]   ;;  %v4205_v63 = vld [vmem:[%s5888_s2 + $0x1b4] ss:$8 sps:$4 sm:$0xff]   ;;  %v4203_v0 = vld [vmem:[%s5888_s2 + $0x1b0] ss:$8 sps:$4 sm:$0xff]  }
  0x28   : > { %977 = vmatprep.subr.bf16.mxu0 %v4134_v12  ;;  %v4211_v1 = vld [vmem:[%s5888_s2 + $0x1c4] ss:$8 sps:$4 sm:$0xff]   ;;  %v4209_v2 = vld [vmem:[%s5888_s2 + $0x1c0] ss:$8 sps:$4 sm:$0xff]   ;;  %v4214_v3 = vld [vmem:[%s5888_s2 + $0x1d4] ss:$8 sps:$4 sm:$0xff]  }
  0x29   : > { %v4212_v4 = vld [vmem:[%s5888_s2 + $0x1d0] ss:$8 sps:$4 sm:$0xff]   ;;  %v4220_v5 = vld [vmem:[%s5888_s2 + $0x1e4] ss:$8 sps:$4 sm:$0xff]   ;;  %v4218_v6 = vld [vmem:[%s5888_s2 + $0x1e0] ss:$8 sps:$4 sm:$0xff]  }
  0x2a   : > { %v4223_v7 = vld [vmem:[%s5888_s2 + $0x1f4] ss:$8 sps:$4 sm:$0xff]   ;;  %v4221_v8 = vld [vmem:[%s5888_s2 + $0x1f0] ss:$8 sps:$4 sm:$0xff]  }
  0x2b   : > { %978 = vmatpush1.bf16.msra.mxu0 %v4136_v14  ;;  %v4224_v9 = vld [vmem:[%s4674_s14 + $0x8] ss:$16 sps:$4 sm:$0xff]   ;;  %v4227_v10 = vld [vmem:[%s4674_s14 + $0x2c] ss:$16 sps:$4 sm:$0xff]  }
  0x2c   : > { %979 = vmatprep.subr.bf16.mxu0 %v4137_v15  ;;  %v4229_v11 = vld [vmem:[%s4674_s14 + $0x28] ss:$16 sps:$4 sm:$0xff]   ;;  %v4230_v12 = vld [vmem:[%s4674_s14 + $0x4c] ss:$16 sps:$4 sm:$0xff]  }
  0x2d   : > { %v4232_v13 = vld [vmem:[%s4674_s14 + $0x48] ss:$16 sps:$4 sm:$0xff]   ;;  %v4233_v14 = vld [vmem:[%s4674_s14 + $0x6c] ss:$16 sps:$4 sm:$0xff]  }
  0x2e   : > { %v4235_v15 = vld [vmem:[%s4674_s14 + $0x68] ss:$16 sps:$4 sm:$0xff]   ;;  %s5903_s14 = sshll.u32 %s4659_s16, 8 }
  0x2f   : > { %980 = vmatpush1.bf16.msra.mxu0 %v4139_v16  ;;  %v4508_v16 = vmov 0.0   ;;  %s4870_s22 = scalar_lea.vmem %s5887_s1, %s5903_s14  ;;  %s3545_s14 = sshll.u32 %s454_s24, 9 }
  0x30   : > { %981 = vmatprep.subr.bf16.mxu0 %v4140_v17  ;;  %1304 = vmatprep.mubr.f32.mxu1 %v4508_v16  ;;  %v555_v17 = vlaneseq  ;;  %s5630_s0 = scalar_lea.vmem [#allocation2], %s3545_s14  ;;  %s4509_s14 = smov [#allocation2]  }
  0x31   : > { %s3442_s30 = sshll.u32 %s5630_s0, 4  ;;  %s5765_s30 = int_to_ptr.vmem [resolvable:$true] %s3442_s30 }
  0x32   : > { %s4444_s27 = scalar_lea.vmem %s5765_s30, 8192 }
  0x33   : > { %982 = vmatpush1.bf16.msra.mxu0 %v4142_v18  ;;  %v556_v18 = vshrl.u32 %v555_v17, 7  ;;  %v1116_v17 = vld [vmem:[%s5890_s4 + $0x28] sm:$0xff]  ;;  %p4445_p11 = scmp.ne.s32.totalorder %s5765_s30, %s4444_s27 }
  0x34   : > { %983 = vmatprep.subr.bf16.mxu0 %v4143_v19 }
  0x35   : > { %v4849_v19 = vsub.s32 0, %v556_v18  ;;  %p4446_p12 = pnand %p4445_p11, %p4620_p5 }
  0x37   : > { %984 = vmatpush1.bf16.msra.mxu0 %v4145_v20  ;;  %v553_v20 = vld [vmem:[%s5889_s3] sm:$0x3]  ;;  %p4447_p13 = pneg %p4446_p12 }
  0x38   : > { %985 = vmatprep.subr.bf16.mxu0 %v4146_v21  ;;  %v4854_v21 = vsub.s32 1, %v556_v18  ;;  %v4251_v18 = vld [vmem:[%s5892_s6 + $0x50] ss:$8 sps:$4 sm:$0xff]  }
  0x3b   : > { %986 = vmatpush1.bf16.msra.mxu0 %v4148_v22  ;;  %v558_v22 = vrot.slane %v553_v20, %v4849_v19 }
  0x3c   : > { %987 = vmatprep.subr.bf16.mxu0 %v4149_v23 }
  0x3f   : > { %988 = vmatpush1.bf16.msra.mxu0 %v4151_v24  ;;  %v562_v24 = vrot.slane %v553_v20, %v4854_v21  ;;  %v4256_v20 = vld [vmem:[%s5892_s6 + $0x64] ss:$8 sps:$4 sm:$0xff]  }
  0x40   : > { %989 = vmatprep.subr.bf16.mxu0 %v4152_v25 }
  0x43   : > { %990 = vmatpush1.bf16.msra.mxu0 %v4154_v26 }
  0x44   : > { %991 = vmatprep.subr.bf16.mxu0 %v4155_v27 }
  0x47   : > { %992 = vmatpush1.bf16.msra.mxu0 %v4157_v28 }
  0x48   : > { %993 = vmatprep.subr.bf16.mxu0 %v4158_v29 }
  0x4b   : > { %994 = vmatpush1.bf16.msra.mxu0 %v4160_v30 }
  0x4c   : > { %995 = vmatprep.subr.bf16.mxu0 %v4161_v31 }
  0x4f   : > { %996 = vmatpush1.bf16.msra.mxu0 %v4163_v32 }
  0x50   : > { %1038 = vmatprep.subr.bf16.mxu0 %v4169_v33 }
  0x52   : > { %998 = vmatmul.mubr.bf16.vlgmr.msra.gmra.mrb[0].mxu0 %v4164_v34 }
  0x53   : > { %1039 = vmatpush1.bf16.msra.mxu0 %v4167_v35  ;;  %1007 = vmatprep.mubr.bf16.mxu0 %v4197_v36 }
  0x54   : > { %1040 = vmatprep.subr.bf16.mxu0 %v4172_v37 }
  0x57   : > { %1041 = vmatpush1.bf16.msra.mxu0 %v4170_v38 }
  0x58   : > { %1042 = vmatprep.subr.bf16.mxu0 %v4175_v39 }
  0x5a   : > { %1008 = vmatmul.mubr.bf16.gmra.mrb[4].mxu0 %v4199_v40 }
  0x5b   : > { %1043 = vmatpush1.bf16.msra.mxu0 %v4173_v41  ;;  %1017 = vmatprep.mubr.bf16.mxu0 %v4206_v42 }
  0x5c   : > { %1044 = vmatprep.subr.bf16.mxu0 %v4178_v43 }
  0x5f   : > { %1045 = vmatpush1.bf16.msra.mxu0 %v4176_v44 }
  0x60   : > { %1046 = vmatprep.subr.bf16.mxu0 %v4181_v45 }
  0x62   : > { %1018 = vmatmul.mubr.bf16.gmra.mrb[8].mxu0 %v4208_v46 }
  0x63   : > { %1047 = vmatpush1.bf16.msra.mxu0 %v4179_v47  ;;  %1027 = vmatprep.mubr.bf16.mxu0 %v4215_v48 }
  0x64   : > { %1048 = vmatprep.subr.bf16.mxu0 %v4184_v49 }
  0x67   : > { %1049 = vmatpush1.bf16.msra.mxu0 %v4182_v50 }
  0x68   : > { %1050 = vmatprep.subr.bf16.mxu0 %v4187_v51 }
  0x6a   : > { %1028 = vmatmul.mubr.bf16.gmra.mrb[12].mxu0 %v4217_v52 }
  0x6b   : > { %1051 = vmatpush1.bf16.msra.mxu0 %v4185_v53  ;;  %1070 = vmatprep.mubr.bf16.mxu0 %v4226_v54 }
  0x6c   : > { %1052 = vmatprep.subr.bf16.mxu0 %v4190_v55 }
  0x6f   : > { %1053 = vmatpush1.bf16.msra.mxu0 %v4188_v56 }
  0x70   : > { %1054 = vmatprep.subr.bf16.mxu0 %v4193_v57 }
  0x73   : > { %1055 = vmatpush1.bf16.msra.mxu0 %v4191_v58 }
  0x74   : > { %1056 = vmatprep.subr.bf16.mxu0 %v4196_v59 }
  0x77   : > { %1057 = vmatpush1.bf16.msra.mxu0 %v4194_v60 }
  0x78   : > { %1058 = vmatprep.subr.bf16.mxu0 %v4202_v61 }
  0x7b   : > { %1059 = vmatpush1.bf16.msra.mxu0 %v4200_v62 }
  0x7c   : > { %1060 = vmatprep.subr.bf16.mxu0 %v4205_v63 }
  0x7f   : > { %1061 = vmatpush1.bf16.msra.mxu0 %v4203_v0  ;;  %v4238_v0 = vld [vmem:[%s5892_s6 + $0x4] ss:$8 sps:$4 sm:$0xff]  }
  0x80   : > { %1062 = vmatprep.subr.bf16.mxu0 %v4211_v1  ;;  %v1111_v1 = vld [vmem:[%s5890_s4] sm:$0xff] }
  0x83   : > { %1063 = vmatpush1.bf16.msra.mxu0 %v4209_v2  ;;  %v4236_v2 = vld [vmem:[%s5892_s6] ss:$8 sps:$4 sm:$0xff]  }
  0x84   : > { %1064 = vmatprep.subr.bf16.mxu0 %v4214_v3  ;;  %v4241_v3 = vld [vmem:[%s5892_s6 + $0x14] ss:$8 sps:$4 sm:$0xff]  }
  0x87   : > { %1065 = vmatpush1.bf16.msra.mxu0 %v4212_v4  ;;  %v1112_v4 = vld [vmem:[%s5890_s4 + $0x8] sm:$0xff] }
  0x88   : > { %1066 = vmatprep.subr.bf16.mxu0 %v4220_v5  ;;  %v4239_v5 = vld [vmem:[%s5892_s6 + $0x10] ss:$8 sps:$4 sm:$0xff]  }
  0x8b   : > { %1067 = vmatpush1.bf16.msra.mxu0 %v4218_v6  ;;  %v4244_v6 = vld [vmem:[%s5892_s6 + $0x24] ss:$8 sps:$4 sm:$0xff]  }
  0x8c   : > { %1068 = vmatprep.subr.bf16.mxu0 %v4223_v7  ;;  %v1113_v7 = vld [vmem:[%s5890_s4 + $0x10] sm:$0xff] }
  0x8f   : > { %1069 = vmatpush1.bf16.msra.mxu0 %v4221_v8  ;;  %v4242_v8 = vld [vmem:[%s5892_s6 + $0x20] ss:$8 sps:$4 sm:$0xff]  }
  0x92   : > { %1071 = vmatmul.mubr.bf16.vlgmr.msra.gmra.mrb[0].mxu0 %v4224_v9  ;;  %v4247_v9 = vld [vmem:[%s5892_s6 + $0x34] ss:$8 sps:$4 sm:$0xff]  }
  0x93   : > { %1080 = vmatprep.mubr.bf16.mxu0 %v4227_v10  ;;  %v1114_v10 = vld [vmem:[%s5890_s4 + $0x18] sm:$0xff] }
  0x9a   : > { %1081 = vmatmul.mubr.bf16.gmra.mrb[4].mxu0 %v4229_v11  ;;  %v4245_v11 = vld [vmem:[%s5892_s6 + $0x30] ss:$8 sps:$4 sm:$0xff]  }
  0x9b   : > { %1090 = vmatprep.mubr.bf16.mxu0 %v4230_v12  ;;  %v4250_v12 = vld [vmem:[%s5892_s6 + $0x44] ss:$8 sps:$4 sm:$0xff]  }
  0xa2   : > { %1091 = vmatmul.mubr.bf16.gmra.mrb[8].mxu0 %v4232_v13  ;;  %v1115_v13 = vld [vmem:[%s5890_s4 + $0x20] sm:$0xff] }
  0xa3   : > { %1100 = vmatprep.mubr.bf16.mxu0 %v4233_v14  ;;  %v4248_v14 = vld [vmem:[%s5892_s6 + $0x40] ss:$8 sps:$4 sm:$0xff]  }
  0xaa   : > { %1101 = vmatmul.mubr.bf16.gmra.mrb[12].mxu0 %v4235_v15  ;;  %v4253_v15 = vld [vmem:[%s5892_s6 + $0x54] ss:$8 sps:$4 sm:$0xff]  }
 0x165   : > { %v1072_v23 = vpop.f32.mrb[0].mxu0 }
 0x166   : > { %v1074_v25 = vpop.f32.mrb[1].mxu0  ;;  %v3978_v27 = vadd.f32 %v1072_v23, %v558_v22  ;;  %v4254_v23 = vld [vmem:[%s5892_s6 + $0x60] ss:$8 sps:$4 sm:$0xff]  }
 0x167   : > { %v1076_v26 = vpop.f32.mrb[2].mxu0  ;;  %v3979_v30 = vadd.f32 %v1074_v25, %v562_v24  ;;  %v1118_v25 = vld [vmem:[%s5890_s4 + $0x38] sm:$0xff] }
 0x168   : > { %v3980_v28 = vadd.f32 %v1076_v26, %v558_v22  ;;  %v1078_v29 = vpop.f32.mrb[3].mxu0  ;;  %v4257_v26 = vld [vmem:[%s5892_s6 + $0x70] ss:$8 sps:$4 sm:$0xff]  }
 0x169   : > { %v3981_v31 = vadd.f32 %v1078_v29, %v562_v24  ;;  %v4260_v29 = vld [vmem:[%s5892_s6 + $0x80] ss:$8 sps:$4 sm:$0xff]  }
 0x16a   : > { %v3932_v32 = vpack.c.bf16 %v3980_v28, %v3978_v27  ;;  %v4262_v27 = vld [vmem:[%s5892_s6 + $0x84] ss:$8 sps:$4 sm:$0xff]  }
 0x16b   : > { %v3930_v33 = vpack.c.bf16 %v3981_v31, %v3979_v30  ;;  %v1119_v28 = vld [vmem:[%s5890_s4 + $0x40] sm:$0xff]  ;;  %v4265_v30 = vld [vmem:[%s5892_s6 + $0x94] ss:$8 sps:$4 sm:$0xff]   ;;  %v1120_v31 = vld [vmem:[%s5890_s4 + $0x48] sm:$0xff] }
 0x16d   : > { %v1082_v34 = vpop.f32.mrb[4].mxu0  ;;  %3931 = vmatprep.subr.bf16.mxu1 %v3930_v33  ;;  %v4268_v33 = vld [vmem:[%s5892_s6 + $0xa4] ss:$8 sps:$4 sm:$0xff]  }
 0x16e   : > { %v1084_v35 = vpop.f32.mrb[5].mxu0  ;;  %3933 = vmatpush1.bf16.msra.mxu1 %v3932_v32  ;;  %v3982_v37 = vadd.f32 %v1082_v34, %v558_v22  ;;  %v4263_v32 = vld [vmem:[%s5892_s6 + $0x90] ss:$8 sps:$4 sm:$0xff]  }
 0x16f   : > { %v1086_v36 = vpop.f32.mrb[6].mxu0  ;;  %v3983_v40 = vadd.f32 %v1084_v35, %v562_v24  ;;  %v1121_v34 = vld [vmem:[%s5890_s4 + $0x50] sm:$0xff]  ;;  %v4266_v35 = vld [vmem:[%s5892_s6 + $0xa0] ss:$8 sps:$4 sm:$0xff]  }
 0x170   : > { %v3984_v38 = vadd.f32 %v1086_v36, %v558_v22  ;;  %v1088_v39 = vpop.f32.mrb[7].mxu0  ;;  %v4271_v36 = vld [vmem:[%s5892_s6 + $0xb4] ss:$8 sps:$4 sm:$0xff]  }
 0x171   : > { %v3985_v41 = vadd.f32 %v1088_v39, %v562_v24  ;;  %v4274_v39 = vld [vmem:[%s5892_s6 + $0xc4] ss:$8 sps:$4 sm:$0xff]  }
 0x172   : > { %v3936_v42 = vpack.c.bf16 %v3984_v38, %v3982_v37  ;;  %v1122_v37 = vld [vmem:[%s5890_s4 + $0x58] sm:$0xff] }
 0x173   : > { %v3934_v43 = vpack.c.bf16 %v3985_v41, %v3983_v40  ;;  %v4269_v38 = vld [vmem:[%s5892_s6 + $0xb0] ss:$8 sps:$4 sm:$0xff]   ;;  %v1123_v40 = vld [vmem:[%s5890_s4 + $0x60] sm:$0xff] }
 0x174   : > { %v4272_v41 = vld [vmem:[%s5892_s6 + $0xc0] ss:$8 sps:$4 sm:$0xff]  }
 0x175   : > { %v1092_v44 = vpop.f32.mrb[8].mxu0  ;;  %3935 = vmatprep.subr.bf16.mxu1 %v3934_v43  ;;  %v1124_v43 = vld [vmem:[%s5890_s4 + $0x68] sm:$0xff] }
 0x176   : > { %v1094_v45 = vpop.f32.mrb[9].mxu0  ;;  %3937 = vmatpush1.bf16.msra.mxu1 %v3936_v42  ;;  %v3986_v47 = vadd.f32 %v1092_v44, %v558_v22  ;;  %v4277_v42 = vld [vmem:[%s5892_s6 + $0xd4] ss:$8 sps:$4 sm:$0xff]   ;;  %v4275_v44 = vld [vmem:[%s5892_s6 + $0xd0] ss:$8 sps:$4 sm:$0xff]  }
 0x177   : > { %v1096_v46 = vpop.f32.mrb[10].mxu0  ;;  %v3987_v50 = vadd.f32 %v1094_v45, %v562_v24  ;;  %v4280_v45 = vld [vmem:[%s5892_s6 + $0xe4] ss:$8 sps:$4 sm:$0xff]  }
 0x178   : > { %v3988_v48 = vadd.f32 %v1096_v46, %v558_v22  ;;  %v1098_v49 = vpop.f32.mrb[11].mxu0  ;;  %v1125_v46 = vld [vmem:[%s5890_s4 + $0x70] sm:$0xff] }
 0x179   : > { %v3989_v51 = vadd.f32 %v1098_v49, %v562_v24  ;;  %v1126_v49 = vld [vmem:[%s5890_s4 + $0x78] sm:$0xff] }
 0x17a   : > { %v3940_v52 = vpack.c.bf16 %v3988_v48, %v3986_v47  ;;  %v4278_v47 = vld [vmem:[%s5892_s6 + $0xe0] ss:$8 sps:$4 sm:$0xff]   ;;  %v4283_v48 = vld [vmem:[%s5892_s6 + $0xf4] ss:$8 sps:$4 sm:$0xff]  }
 0x17b   : > { %v3938_v53 = vpack.c.bf16 %v3989_v51, %v3987_v50  ;;  %v4281_v50 = vld [vmem:[%s5892_s6 + $0xf0] ss:$8 sps:$4 sm:$0xff]   ;;  %v4289_v51 = vld [vmem:[%s5891_s5 + $0x4] ss:$8 sps:$4 sm:$0xff]  }
 0x17d   : > { %v1102_v54 = vpop.f32.mrb[12].mxu0  ;;  %3939 = vmatprep.subr.bf16.mxu1 %v3938_v53  ;;  %v1128_v53 = vld [vmem:[%s5890_s4 + $0x88] sm:$0xff] }
 0x17e   : > { %v1104_v55 = vpop.f32.mrb[13].mxu0  ;;  %3941 = vmatpush1.bf16.msra.mxu1 %v3940_v52  ;;  %v3990_v57 = vadd.f32 %v1102_v54, %v558_v22  ;;  %v1127_v52 = vld [vmem:[%s5890_s4 + $0x80] sm:$0xff]  ;;  %v1129_v54 = vld [vmem:[%s5890_s4 + $0x90] sm:$0xff] }
 0x17f   : > { %v1106_v56 = vpop.f32.mrb[14].mxu0  ;;  %v3991_v60 = vadd.f32 %v1104_v55, %v562_v24  ;;  %v1130_v55 = vld [vmem:[%s5890_s4 + $0x98] sm:$0xff] }
 0x180   : > { %v3992_v58 = vadd.f32 %v1106_v56, %v558_v22  ;;  %v1108_v59 = vpop.f32.mrb[15].mxu0  ;;  %v1117_v22 = vld [vmem:[%s5890_s4 + $0x30] sm:$0xff]  ;;  %v1131_v56 = vld [vmem:[%s5890_s4 + $0xa0] sm:$0xff] }
 0x181   : > { %v3993_v61 = vadd.f32 %v1108_v59, %v562_v24  ;;  %v4259_v24 = vld [vmem:[%s5892_s6 + $0x74] ss:$8 sps:$4 sm:$0xff]  }
 0x182   : > { %v3944_v62 = vpack.c.bf16 %v3992_v58, %v3990_v57  ;;  %v1132_v57 = vld [vmem:[%s5890_s4 + $0xa8] sm:$0xff]  ;;  %v1133_v58 = vld [vmem:[%s5890_s4 + $0xb0] sm:$0xff]  ;;  %v1134_v59 = vld [vmem:[%s5890_s4 + $0xb8] sm:$0xff] }
 0x183   : > { %v3942_v63 = vpack.c.bf16 %v3993_v61, %v3991_v60  ;;  %v1135_v60 = vld [vmem:[%s5890_s4 + $0xc0] sm:$0xff]  ;;  %v1136_v61 = vld [vmem:[%s5890_s4 + $0xc8] sm:$0xff] }
 0x185   : > { %3943 = vmatprep.subr.bf16.mxu1 %v3942_v63  ;;  %v1138_v63 = vld [vmem:[%s5890_s4 + $0xd8] sm:$0xff] }
 0x186   : > { %3945 = vmatpush1.bf16.msra.mxu1 %v3944_v62  ;;  %v1137_v62 = vld [vmem:[%s5890_s4 + $0xd0] sm:$0xff] }
 0x187   : > { %1945 = vmatprep.subr.bf16.mxu1 %v4238_v0  ;;  %v1139_v0 = vld [vmem:[%s5890_s4 + $0xe0] sm:$0xff] }
 0x189   : > { %3632 = vmatmul.mubr.msk.f32.vlgmr.msra.gmra.mrb[0].mxu1 %vm1143_vm0, %v1111_v1  ;;  %v1140_v1 = vld [vmem:[%s5890_s4 + $0xe8] sm:$0xff] }
 0x18a   : > { %1946 = vmatpush1.bf16.msra.mxu1 %v4236_v2  ;;  %1310 = vmatprep.mubr.f32.mxu1 %v4508_v16  ;;  %v1141_v2 = vld [vmem:[%s5890_s4 + $0xf0] sm:$0xff] }
 0x18b   : > { %1947 = vmatprep.subr.bf16.mxu1 %v4241_v3  ;;  %v1142_v3 = vld [vmem:[%s5890_s4 + $0xf8] sm:$0xff] }
 0x18d   : > { %3633 = vmatmul.mubr.msk.f32.gmra.mrb[2].mxu1 %vm1143_vm0, %v1112_v4  ;;  %v4286_v4 = vld [vmem:[%s4870_s22 + $0x4] ss:$8 sps:$4 sm:$0xff]  }
 0x18e   : > { %1316 = vmatprep.mubr.f32.mxu1 %v4508_v16  ;;  %1948 = vmatpush1.bf16.msra.mxu1 %v4239_v5  ;;  %v4284_v5 = vld [vmem:[%s4870_s22] ss:$8 sps:$4 sm:$0xff]  }
 0x18f   : > { %1949 = vmatprep.subr.bf16.mxu1 %v4244_v6  ;;  %v4287_v6 = vld [vmem:[%s5891_s5] ss:$8 sps:$4 sm:$0xff]  }
 0x191   : > { %3634 = vmatmul.mubr.msk.f32.gmra.mrb[4].mxu1 %vm1143_vm0, %v1113_v7  ;;  %v4290_v7 = vld [vmem:[%s4870_s22 + $0x14] ss:$8 sps:$4 sm:$0xff]  }
 0x192   : > { %1322 = vmatprep.mubr.f32.mxu1 %v4508_v16  ;;  %1950 = vmatpush1.bf16.msra.mxu1 %v4242_v8  ;;  %v4295_v8 = vld [vmem:[%s5891_s5 + $0x14] ss:$8 sps:$4 sm:$0xff]  }
 0x193   : > { %1951 = vmatprep.subr.bf16.mxu1 %v4247_v9  ;;  %v4301_v9 = vld [vmem:[%s5891_s5 + $0x24] ss:$8 sps:$4 sm:$0xff]  }
 0x195   : > { %3635 = vmatmul.mubr.msk.f32.gmra.mrb[6].mxu1 %vm1143_vm0, %v1114_v10  ;;  %v4292_v10 = vld [vmem:[%s4870_s22 + $0x10] ss:$8 sps:$4 sm:$0xff]  }
 0x196   : > { %1328 = vmatprep.mubr.f32.mxu1 %v4508_v16  ;;  %1952 = vmatpush1.bf16.msra.mxu1 %v4245_v11  ;;  %v4296_v11 = vld [vmem:[%s4870_s22 + $0x24] ss:$8 sps:$4 sm:$0xff]  }
 0x197   : > { %1953 = vmatprep.subr.bf16.mxu1 %v4250_v12  ;;  %v4299_v12 = vld [vmem:[%s5891_s5 + $0x20] ss:$8 sps:$4 sm:$0xff]  }
 0x199   : > { %3636 = vmatmul.mubr.msk.f32.gmra.mrb[8].mxu1 %vm1143_vm0, %v1115_v13  ;;  %v4307_v13 = vld [vmem:[%s5891_s5 + $0x34] ss:$8 sps:$4 sm:$0xff]  }
 0x19a   : > { %1334 = vmatprep.mubr.f32.mxu1 %v4508_v16  ;;  %1954 = vmatpush1.bf16.msra.mxu1 %v4248_v14  ;;  %v4305_v14 = vld [vmem:[%s5891_s5 + $0x30] ss:$8 sps:$4 sm:$0xff]  }
 0x19b   : > { %1955 = vmatprep.subr.bf16.mxu1 %v4253_v15  ;;  %v4313_v15 = vld [vmem:[%s5891_s5 + $0x44] ss:$8 sps:$4 sm:$0xff]  }
 0x19d   : > { %3637 = vmatmul.mubr.msk.f32.gmra.mrb[10].mxu1 %vm1143_vm0, %v1116_v17  ;;  %v4298_v17 = vld [vmem:[%s4870_s22 + $0x20] ss:$8 sps:$4 sm:$0xff]  }
 0x19e   : > { %1340 = vmatprep.mubr.f32.mxu1 %v4508_v16  ;;  %1956 = vmatpush1.bf16.msra.mxu1 %v4251_v18  ;;  %v4302_v18 = vld [vmem:[%s4870_s22 + $0x34] ss:$8 sps:$4 sm:$0xff]  }
 0x19f   : > { %1957 = vmatprep.subr.bf16.mxu1 %v4256_v20  ;;  %v4311_v20 = vld [vmem:[%s5891_s5 + $0x40] ss:$8 sps:$4 sm:$0xff]  }
 0x1a1   : > { %3638 = vmatmul.mubr.msk.f32.gmra.mrb[12].mxu1 %vm1143_vm0, %v1117_v22  ;;  %v4319_v22 = vld [vmem:[%s5891_s5 + $0x54] ss:$8 sps:$4 sm:$0xff]  }
 0x1a2   : > { %1346 = vmatprep.mubr.f32.mxu1 %v4508_v16  ;;  %1958 = vmatpush1.bf16.msra.mxu1 %v4254_v23  ;;  %v4317_v23 = vld [vmem:[%s5891_s5 + $0x50] ss:$8 sps:$4 sm:$0xff]  }
 0x1a3   : > { %1959 = vmatprep.subr.bf16.mxu1 %v4259_v24  ;;  %v4325_v24 = vld [vmem:[%s5891_s5 + $0x64] ss:$8 sps:$4 sm:$0xff]  }
 0x1a5   : > { %3639 = vmatmul.mubr.msk.f32.gmra.mrb[14].mxu1 %vm1143_vm0, %v1118_v25  ;;  %v4304_v25 = vld [vmem:[%s4870_s22 + $0x30] ss:$8 sps:$4 sm:$0xff]  }
 0x1a6   : > { %1352 = vmatprep.mubr.f32.mxu1 %v4508_v16  ;;  %1960 = vmatpush1.bf16.msra.mxu1 %v4257_v26  ;;  %v4308_v26 = vld [vmem:[%s4870_s22 + $0x44] ss:$8 sps:$4 sm:$0xff]  }
 0x1a7   : > { %1961 = vmatprep.subr.bf16.mxu1 %v4262_v27  ;;  %v4323_v27 = vld [vmem:[%s5891_s5 + $0x60] ss:$8 sps:$4 sm:$0xff]  }
 0x1a9   : > { %3640 = vmatmul.mubr.msk.f32.gmra.mrb[16].mxu1 %vm1143_vm0, %v1119_v28  ;;  %v4331_v28 = vld [vmem:[%s5891_s5 + $0x74] ss:$8 sps:$4 sm:$0xff]  }
 0x1aa   : > { %1358 = vmatprep.mubr.f32.mxu1 %v4508_v16  ;;  %1962 = vmatpush1.bf16.msra.mxu1 %v4260_v29  ;;  %v4329_v29 = vld [vmem:[%s5891_s5 + $0x70] ss:$8 sps:$4 sm:$0xff]  }
 0x1ab   : > { %1963 = vmatprep.subr.bf16.mxu1 %v4265_v30  ;;  %v4337_v30 = vld [vmem:[%s5891_s5 + $0x84] ss:$8 sps:$4 sm:$0xff]  }
 0x1ad   : > { %3641 = vmatmul.mubr.msk.f32.gmra.mrb[18].mxu1 %vm1143_vm0, %v1120_v31  ;;  %v4310_v31 = vld [vmem:[%s4870_s22 + $0x40] ss:$8 sps:$4 sm:$0xff]  }
 0x1ae   : > { %1364 = vmatprep.mubr.f32.mxu1 %v4508_v16  ;;  %1964 = vmatpush1.bf16.msra.mxu1 %v4263_v32  ;;  %v4314_v32 = vld [vmem:[%s4870_s22 + $0x54] ss:$8 sps:$4 sm:$0xff]  }
 0x1af   : > { %1965 = vmatprep.subr.bf16.mxu1 %v4268_v33  ;;  %v4335_v33 = vld [vmem:[%s5891_s5 + $0x80] ss:$8 sps:$4 sm:$0xff]  }
 0x1b1   : > { %3642 = vmatmul.mubr.msk.f32.gmra.mrb[20].mxu1 %vm1143_vm0, %v1121_v34  ;;  %v4343_v34 = vld [vmem:[%s5891_s5 + $0x94] ss:$8 sps:$4 sm:$0xff]  }
 0x1b2   : > { %1370 = vmatprep.mubr.f32.mxu1 %v4508_v16  ;;  %1966 = vmatpush1.bf16.msra.mxu1 %v4266_v35  ;;  %v4341_v35 = vld [vmem:[%s5891_s5 + $0x90] ss:$8 sps:$4 sm:$0xff]  }
 0x1b3   : > { %1967 = vmatprep.subr.bf16.mxu1 %v4271_v36  ;;  %v4349_v36 = vld [vmem:[%s5891_s5 + $0xa4] ss:$8 sps:$4 sm:$0xff]  }
 0x1b5   : > { %3643 = vmatmul.mubr.msk.f32.gmra.mrb[22].mxu1 %vm1143_vm0, %v1122_v37  ;;  %v4316_v37 = vld [vmem:[%s4870_s22 + $0x50] ss:$8 sps:$4 sm:$0xff]  }
 0x1b6   : > { %1376 = vmatprep.mubr.f32.mxu1 %v4508_v16  ;;  %1968 = vmatpush1.bf16.msra.mxu1 %v4269_v38  ;;  %v4320_v38 = vld [vmem:[%s4870_s22 + $0x64] ss:$8 sps:$4 sm:$0xff]  }
 0x1b7   : > { %1969 = vmatprep.subr.bf16.mxu1 %v4274_v39  ;;  %v4347_v39 = vld [vmem:[%s5891_s5 + $0xa0] ss:$8 sps:$4 sm:$0xff]  }
 0x1b9   : > { %3644 = vmatmul.mubr.msk.f32.gmra.mrb[24].mxu1 %vm1143_vm0, %v1123_v40  ;;  %v4355_v40 = vld [vmem:[%s5891_s5 + $0xb4] ss:$8 sps:$4 sm:$0xff]  }
 0x1ba   : > { %1382 = vmatprep.mubr.f32.mxu1 %v4508_v16  ;;  %1970 = vmatpush1.bf16.msra.mxu1 %v4272_v41  ;;  %v4353_v41 = vld [vmem:[%s5891_s5 + $0xb0] ss:$8 sps:$4 sm:$0xff]  }
 0x1bb   : > { %1971 = vmatprep.subr.bf16.mxu1 %v4277_v42  ;;  %v4361_v42 = vld [vmem:[%s5891_s5 + $0xc4] ss:$8 sps:$4 sm:$0xff]  }
 0x1bd   : > { %3645 = vmatmul.mubr.msk.f32.gmra.mrb[26].mxu1 %vm1143_vm0, %v1124_v43  ;;  %v4322_v43 = vld [vmem:[%s4870_s22 + $0x60] ss:$8 sps:$4 sm:$0xff]  }
 0x1be   : > { %1388 = vmatprep.mubr.f32.mxu1 %v4508_v16  ;;  %1972 = vmatpush1.bf16.msra.mxu1 %v4275_v44  ;;  %v4326_v44 = vld [vmem:[%s4870_s22 + $0x74] ss:$8 sps:$4 sm:$0xff]  }
 0x1bf   : > { %1973 = vmatprep.subr.bf16.mxu1 %v4280_v45  ;;  %v4359_v45 = vld [vmem:[%s5891_s5 + $0xc0] ss:$8 sps:$4 sm:$0xff]  }
 0x1c1   : > { %3646 = vmatmul.mubr.msk.f32.gmra.mrb[28].mxu1 %vm1143_vm0, %v1125_v46  ;;  %v4367_v46 = vld [vmem:[%s5891_s5 + $0xd4] ss:$8 sps:$4 sm:$0xff]  }
 0x1c2   : > { %1394 = vmatprep.mubr.f32.mxu1 %v4508_v16  ;;  %1974 = vmatpush1.bf16.msra.mxu1 %v4278_v47  ;;  %v4365_v47 = vld [vmem:[%s5891_s5 + $0xd0] ss:$8 sps:$4 sm:$0xff]  }
 0x1c3   : > { %1975 = vmatprep.subr.bf16.mxu1 %v4283_v48  ;;  %v4373_v48 = vld [vmem:[%s5891_s5 + $0xe4] ss:$8 sps:$4 sm:$0xff]  }
 0x1c5   : > { %3647 = vmatmul.mubr.msk.f32.gmra.mrb[30].mxu1 %vm1143_vm0, %v1126_v49  ;;  %v4328_v49 = vld [vmem:[%s4870_s22 + $0x70] ss:$8 sps:$4 sm:$0xff]  }
 0x1c6   : > { %1400 = vmatprep.mubr.f32.mxu1 %v4508_v16  ;;  %1976 = vmatpush1.bf16.msra.mxu1 %v4281_v50  ;;  %v4332_v50 = vld [vmem:[%s4870_s22 + $0x84] ss:$8 sps:$4 sm:$0xff]  }
 0x1c7   : > { %2298 = vmatprep.subr.bf16.mxu1 %v4289_v51  ;;  %v4371_v51 = vld [vmem:[%s5891_s5 + $0xe0] ss:$8 sps:$4 sm:$0xff]  }
 0x1c9   : > { %3648 = vmatmul.mubr.msk.f32.gmra.mrb[32].mxu1 %vm1143_vm0, %v1127_v52  ;;  %v4379_v52 = vld [vmem:[%s5891_s5 + $0xf4] ss:$8 sps:$4 sm:$0xff]  }
 0x1ca   : > { %1406 = vmatprep.mubr.f32.mxu1 %v4508_v16 }
 0x1cd   : > { %3649 = vmatmul.mubr.msk.f32.gmra.mrb[34].mxu1 %vm1143_vm0, %v1128_v53  ;;  %v4377_v53 = vld [vmem:[%s5891_s5 + $0xf0] ss:$8 sps:$4 sm:$0xff]  }
 0x1ce   : > { %1412 = vmatprep.mubr.f32.mxu1 %v4508_v16 }
 0x1d1   : > { %3650 = vmatmul.mubr.msk.f32.gmra.mrb[36].mxu1 %vm1143_vm0, %v1129_v54  ;;  %v4334_v54 = vld [vmem:[%s4870_s22 + $0x80] ss:$8 sps:$4 sm:$0xff]  }
 0x1d2   : > { %1418 = vmatprep.mubr.f32.mxu1 %v4508_v16 }
 0x1d5   : > { %3651 = vmatmul.mubr.msk.f32.gmra.mrb[38].mxu1 %vm1143_vm0, %v1130_v55  ;;  %v4338_v55 = vld [vmem:[%s4870_s22 + $0x94] ss:$8 sps:$4 sm:$0xff]  }
 0x1d6   : > { %1424 = vmatprep.mubr.f32.mxu1 %v4508_v16 }
 0x1d9   : > { %3652 = vmatmul.mubr.msk.f32.gmra.mrb[40].mxu1 %vm1143_vm0, %v1131_v56  ;;  %v4340_v56 = vld [vmem:[%s4870_s22 + $0x90] ss:$8 sps:$4 sm:$0xff]  }
 0x1da   : > { %1430 = vmatprep.mubr.f32.mxu1 %v4508_v16 }
 0x1dd   : > { %3653 = vmatmul.mubr.msk.f32.gmra.mrb[42].mxu1 %vm1143_vm0, %v1132_v57  ;;  %v4344_v57 = vld [vmem:[%s4870_s22 + $0xa4] ss:$8 sps:$4 sm:$0xff]  }
 0x1de   : > { %1436 = vmatprep.mubr.f32.mxu1 %v4508_v16 }
 0x1e1   : > { %3654 = vmatmul.mubr.msk.f32.gmra.mrb[44].mxu1 %vm1143_vm0, %v1133_v58  ;;  %v4346_v58 = vld [vmem:[%s4870_s22 + $0xa0] ss:$8 sps:$4 sm:$0xff]  }
 0x1e2   : > { %1442 = vmatprep.mubr.f32.mxu1 %v4508_v16 }
 0x1e5   : > { %3655 = vmatmul.mubr.msk.f32.gmra.mrb[46].mxu1 %vm1143_vm0, %v1134_v59  ;;  %v4350_v59 = vld [vmem:[%s4870_s22 + $0xb4] ss:$8 sps:$4 sm:$0xff]  }
 0x1e6   : > { %1448 = vmatprep.mubr.f32.mxu1 %v4508_v16 }
 0x1e9   : > { %3656 = vmatmul.mubr.msk.f32.gmra.mrb[48].mxu1 %vm1143_vm0, %v1135_v60 }
 0x1ea   : > { %1454 = vmatprep.mubr.f32.mxu1 %v4508_v16 }
 0x1ed   : > { %3657 = vmatmul.mubr.msk.f32.gmra.mrb[50].mxu1 %vm1143_vm0, %v1136_v61 }
 0x1ee   : > { %1460 = vmatprep.mubr.f32.mxu1 %v4508_v16 }
 0x1f1   : > { %3658 = vmatmul.mubr.msk.f32.gmra.mrb[52].mxu1 %vm1143_vm0, %v1137_v62  ;;  %v4352_v62 = vld [vmem:[%s4870_s22 + $0xb0] ss:$8 sps:$4 sm:$0xff]  }
 0x1f2   : > { %1466 = vmatprep.mubr.f32.mxu1 %v4508_v16 }
 0x1f5   : > { %3659 = vmatmul.mubr.msk.f32.gmra.mrb[54].mxu1 %vm1143_vm0, %v1138_v63  ;;  %v4356_v63 = vld [vmem:[%s4870_s22 + $0xc4] ss:$8 sps:$4 sm:$0xff]  }
 0x1f6   : > { %1472 = vmatprep.mubr.f32.mxu1 %v4508_v16 }
 0x1f9   : > { %3660 = vmatmul.mubr.msk.f32.gmra.mrb[56].mxu1 %vm1143_vm0, %v1139_v0 }
 0x1fa   : > { %1478 = vmatprep.mubr.f32.mxu1 %v4508_v16 }
 0x1fd   : > { %3661 = vmatmul.mubr.msk.f32.gmra.mrb[58].mxu1 %vm1143_vm0, %v1140_v1 }
 0x1fe   : > { %1484 = vmatprep.mubr.f32.mxu1 %v4508_v16 }
 0x201   : > { %3662 = vmatmul.mubr.msk.f32.gmra.mrb[60].mxu1 %vm1143_vm0, %v1141_v2 }
 0x202   : > { %1490 = vmatprep.mubr.f32.mxu1 %v4508_v16  ;;  %v4293_v16 = vld [vmem:[%s5891_s5 + $0x10] ss:$8 sps:$4 sm:$0xff]  }
 0x205   : > { %3663 = vmatmul.mubr.msk.f32.gmra.mrb[62].mxu1 %vm1143_vm0, %v1142_v3 }
 0x206   : > { %1977 = vmatprep.mubr.bf16.mxu1 %v4286_v4 }
 0x209   : > { %1978 = vmatmul.mubr.bf16.vlgmr.msra.gmra.mrb[64].mxu1 %v4284_v5 }
 0x20a   : > { %2299 = vmatpush1.bf16.msra.mxu1 %v4287_v6  ;;  %1987 = vmatprep.mubr.bf16.mxu1 %v4290_v7  ;;  %v4358_v6 = vld [vmem:[%s4870_s22 + $0xc0] ss:$8 sps:$4 sm:$0xff]   ;;  %v4362_v7 = vld [vmem:[%s4870_s22 + $0xd4] ss:$8 sps:$4 sm:$0xff]  }
 0x20b   : > { %2300 = vmatprep.subr.bf16.mxu1 %v4295_v8 }
 0x20e   : > { %2301 = vmatpush1.bf16.msra.mxu1 %v4293_v16 }
 0x20f   : > { %2302 = vmatprep.subr.bf16.mxu1 %v4301_v9 }
 0x211   : > { %1988 = vmatmul.mubr.bf16.gmra.mrb[68].mxu1 %v4292_v10 }
 0x212   : > { %1997 = vmatprep.mubr.bf16.mxu1 %v4296_v11  ;;  %2303 = vmatpush1.bf16.msra.mxu1 %v4299_v12 }
 0x213   : > { %2304 = vmatprep.subr.bf16.mxu1 %v4307_v13  ;;  %v4364_v13 = vld [vmem:[%s4870_s22 + $0xd0] ss:$8 sps:$4 sm:$0xff]  }
 0x216   : > { %2305 = vmatpush1.bf16.msra.mxu1 %v4305_v14  ;;  %v4368_v14 = vld [vmem:[%s4870_s22 + $0xe4] ss:$8 sps:$4 sm:$0xff]  }
 0x217   : > { %2306 = vmatprep.subr.bf16.mxu1 %v4313_v15 }
 0x219   : > { %1998 = vmatmul.mubr.bf16.gmra.mrb[72].mxu1 %v4298_v17 }
 0x21a   : > { %2007 = vmatprep.mubr.bf16.mxu1 %v4302_v18  ;;  %2307 = vmatpush1.bf16.msra.mxu1 %v4311_v20 }
 0x21b   : > { %2308 = vmatprep.subr.bf16.mxu1 %v4319_v22 }
 0x21e   : > { %2309 = vmatpush1.bf16.msra.mxu1 %v4317_v23 }
 0x21f   : > { %2310 = vmatprep.subr.bf16.mxu1 %v4325_v24  ;;  %v4370_v24 = vld [vmem:[%s4870_s22 + $0xe0] ss:$8 sps:$4 sm:$0xff]  }
 0x221   : > { %2008 = vmatmul.mubr.bf16.gmra.mrb[76].mxu1 %v4304_v25  ;;  %v4374_v25 = vld [vmem:[%s4870_s22 + $0xf4] ss:$8 sps:$4 sm:$0xff]  }
 0x222   : > { %2017 = vmatprep.mubr.bf16.mxu1 %v4308_v26  ;;  %2311 = vmatpush1.bf16.msra.mxu1 %v4323_v27 }
 0x223   : > { %2312 = vmatprep.subr.bf16.mxu1 %v4331_v28 }
 0x226   : > { %2313 = vmatpush1.bf16.msra.mxu1 %v4329_v29 }
 0x227   : > { %2314 = vmatprep.subr.bf16.mxu1 %v4337_v30 }
 0x229   : > { %2018 = vmatmul.mubr.bf16.gmra.mrb[80].mxu1 %v4310_v31 }
 0x22a   : > { %2027 = vmatprep.mubr.bf16.mxu1 %v4314_v32  ;;  %2315 = vmatpush1.bf16.msra.mxu1 %v4335_v33  ;;  %v4376_v32 = vld [vmem:[%s4870_s22 + $0xf0] ss:$8 sps:$4 sm:$0xff]   ;;  %s3817_s22 = sshll.u32 %s4603_s29, 13  ;;  %s5774_s29 = scalar_lea.sflag [#allocation3], %s454_s24 }
 0x22b   : > { %2316 = vmatprep.subr.bf16.mxu1 %v4343_v34  ;;  %s5763_s17 = scalar_lea.hbm %s5899_s13, %s3817_s22 }
 0x22e   : > { %2317 = vmatpush1.bf16.msra.mxu1 %v4341_v35 }
 0x22f   : > { %2318 = vmatprep.subr.bf16.mxu1 %v4349_v36  ;;  %v4380_v36 = vld [vmem:[%s5894_s8] ss:$8 sps:$4 sm:$0xff]  }
 0x231   : > { %2028 = vmatmul.mubr.bf16.gmra.mrb[84].mxu1 %v4316_v37  ;;  %v4382_v37 = vld [vmem:[%s5894_s8 + $0x4] ss:$8 sps:$4 sm:$0xff]  }
 0x232   : > { %2037 = vmatprep.mubr.bf16.mxu1 %v4320_v38  ;;  %2319 = vmatpush1.bf16.msra.mxu1 %v4347_v39  ;;  %v4385_v39 = vld [vmem:[%s5894_s8 + $0x14] ss:$8 sps:$4 sm:$0xff]  }
 0x233   : > { %2320 = vmatprep.subr.bf16.mxu1 %v4355_v40  ;;  %2803 = vmatprep.subr.bf16.mxu0 %v4382_v37 }
 0x234   : > { %2804 = vmatpush1.bf16.msra.mxu0 %v4380_v36 }
 0x235   : > { %2805 = vmatprep.subr.bf16.mxu0 %v4385_v39 }
 0x236   : > { %2321 = vmatpush1.bf16.msra.mxu1 %v4353_v41  ;;  %v4383_v41 = vld [vmem:[%s5894_s8 + $0x10] ss:$8 sps:$4 sm:$0xff]  }
 0x237   : > { %2322 = vmatprep.subr.bf16.mxu1 %v4361_v42 }
 0x238   : > { %2806 = vmatpush1.bf16.msra.mxu0 %v4383_v41 }
 0x239   : > { %2038 = vmatmul.mubr.bf16.gmra.mrb[88].mxu1 %v4322_v43  ;;  %v4388_v43 = vld [vmem:[%s5894_s8 + $0x24] ss:$8 sps:$4 sm:$0xff]  }
 0x23a   : > { %2047 = vmatprep.mubr.bf16.mxu1 %v4326_v44  ;;  %2323 = vmatpush1.bf16.msra.mxu1 %v4359_v45  ;;  %v4386_v45 = vld [vmem:[%s5894_s8 + $0x20] ss:$8 sps:$4 sm:$0xff]  }
 0x23b   : > { %2324 = vmatprep.subr.bf16.mxu1 %v4367_v46  ;;  %2807 = vmatprep.subr.bf16.mxu0 %v4388_v43 }
 0x23c   : > { %2808 = vmatpush1.bf16.msra.mxu0 %v4386_v45 }
 0x23e   : > { %2325 = vmatpush1.bf16.msra.mxu1 %v4365_v47 }
 0x23f   : > { %2326 = vmatprep.subr.bf16.mxu1 %v4373_v48  ;;  %v4391_v48 = vld [vmem:[%s5894_s8 + $0x34] ss:$8 sps:$4 sm:$0xff]  }
 0x240   : > { %2809 = vmatprep.subr.bf16.mxu0 %v4391_v48 }
 0x241   : > { %2048 = vmatmul.mubr.bf16.gmra.mrb[92].mxu1 %v4328_v49 }
 0x242   : > { %2057 = vmatprep.mubr.bf16.mxu1 %v4332_v50  ;;  %2327 = vmatpush1.bf16.msra.mxu1 %v4371_v51  ;;  %v4389_v51 = vld [vmem:[%s5894_s8 + $0x30] ss:$8 sps:$4 sm:$0xff]  }
 0x243   : > { %2328 = vmatprep.subr.bf16.mxu1 %v4379_v52  ;;  %2810 = vmatpush1.bf16.msra.mxu0 %v4389_v51 }
 0x246   : > { %2329 = vmatpush1.bf16.msra.mxu1 %v4377_v53  ;;  %v4394_v53 = vld [vmem:[%s5894_s8 + $0x44] ss:$8 sps:$4 sm:$0xff]  }
 0x247   : > { %3946 = vmatprep.subr.bf16.mxu1 %v4382_v37  ;;  %2811 = vmatprep.subr.bf16.mxu0 %v4394_v53 }
 0x249   : > { %2058 = vmatmul.mubr.bf16.gmra.mrb[96].mxu1 %v4334_v54 }
 0x24a   : > { %2067 = vmatprep.mubr.bf16.mxu1 %v4338_v55  ;;  %v4392_v55 = vld [vmem:[%s5894_s8 + $0x40] ss:$8 sps:$4 sm:$0xff]  }
 0x24b   : > { %2812 = vmatpush1.bf16.msra.mxu0 %v4392_v55 }
 0x251   : > { %2068 = vmatmul.mubr.bf16.gmra.mrb[100].mxu1 %v4340_v56 }
 0x252   : > { %2077 = vmatprep.mubr.bf16.mxu1 %v4344_v57 }
 0x259   : > { %2078 = vmatmul.mubr.bf16.gmra.mrb[104].mxu1 %v4346_v58  ;;  %v4397_v58 = vld [vmem:[%s5894_s8 + $0x54] ss:$8 sps:$4 sm:$0xff]  }
 0x25a   : > { %2087 = vmatprep.mubr.bf16.mxu1 %v4350_v59  ;;  %2813 = vmatprep.subr.bf16.mxu0 %v4397_v58 }
 0x25c   : > { %v5240_v60 = vpop.f32.mrb[0].mxu1 }
 0x25d   : > { %v1308_v61 = vpop.f32.mrb[1].mxu1 }
 0x260   : > { %v1312_v0 = vpop.f32.mrb[2].mxu1 }
 0x261   : > { %v1497_v1 = vpack.c.bf16 %v1312_v0, %v5240_v60  ;;  %v1314_v2 = vpop.f32.mrb[3].mxu1  ;;  %2088 = vmatmul.mubr.bf16.gmra.mrb[108].mxu1 %v4352_v62 }
 0x262   : > { %v1498_v3 = vpack.c.bf16 %v1314_v2, %v1308_v61  ;;  %2097 = vmatprep.mubr.bf16.mxu1 %v4356_v63  ;;  %v4395_v61 = vld [vmem:[%s5894_s8 + $0x50] ss:$8 sps:$4 sm:$0xff]   ;;  %v4400_v63 = vld [vmem:[%s5894_s8 + $0x64] ss:$8 sps:$4 sm:$0xff]  }
 0x263   : > { %2814 = vmatpush1.bf16.msra.mxu0 %v4395_v61 }
 0x264   : > { %v5245_v4 = vpop.f32.mrb[4].mxu1  ;;  %2815 = vmatprep.subr.bf16.mxu0 %v4400_v63 }
 0x265   : > { %v1320_v5 = vpop.f32.mrb[5].mxu1 }
 0x268   : > { %v5249_v8 = vpop.f32.mrb[6].mxu1 }
 0x269   : > { %v1499_v16 = vpack.c.bf16 %v5249_v8, %v5245_v4  ;;  %v1326_v9 = vpop.f32.mrb[7].mxu1  ;;  %2098 = vmatmul.mubr.bf16.gmra.mrb[112].mxu1 %v4358_v6  ;;  %v4403_v4 = vld [vmem:[%s5894_s8 + $0x74] ss:$8 sps:$4 sm:$0xff]  }
 0x26a   : > { %v1500_v10 = vpack.c.bf16 %v1326_v9, %v1320_v5  ;;  %2107 = vmatprep.mubr.bf16.mxu1 %v4362_v7  ;;  %v4401_v7 = vld [vmem:[%s5894_s8 + $0x70] ss:$8 sps:$4 sm:$0xff]  }
 0x26c   : > { %v5253_v11 = vpop.f32.mrb[8].mxu1 }
 0x26d   : > { %v5255_v12 = vpop.f32.mrb[9].mxu1 }
 0x270   : > { %v5259_v15 = vpop.f32.mrb[10].mxu1 }
 0x271   : > { %v1501_v17 = vpack.c.bf16 %v5259_v15, %v5253_v11  ;;  %v5263_v18 = vpop.f32.mrb[11].mxu1  ;;  %2108 = vmatmul.mubr.bf16.gmra.mrb[116].mxu1 %v4364_v13  ;;  %v4409_v13 = vld [vmem:[%s5894_s8 + $0x94] ss:$8 sps:$4 sm:$0xff]  }
 0x272   : > { %v1502_v20 = vpack.c.bf16 %v5263_v18, %v5255_v12  ;;  %2117 = vmatprep.mubr.bf16.mxu1 %v4368_v14 }
 0x274   : > { %v5267_v22 = vpop.f32.mrb[12].mxu1 }
 0x275   : > { %v5269_v23 = vpop.f32.mrb[13].mxu1 }
 0x278   : > { %v5273_v26 = vpop.f32.mrb[14].mxu1 }
 0x279   : > { %v1503_v27 = vpack.c.bf16 %v5273_v26, %v5267_v22  ;;  %v5277_v28 = vpop.f32.mrb[15].mxu1  ;;  %2118 = vmatmul.mubr.bf16.gmra.mrb[120].mxu1 %v4370_v24  ;;  %v4415_v26 = vld [vmem:[%s5894_s8 + $0xb4] ss:$8 sps:$4 sm:$0xff]  }
 0x27a   : > { %v1504_v29 = vpack.c.bf16 %v5277_v28, %v5269_v23  ;;  %2127 = vmatprep.mubr.bf16.mxu1 %v4374_v25  ;;  %v4410_v23 = vld [vmem:[%s5894_s8 + $0xa0] ss:$8 sps:$4 sm:$0xff]  }
 0x27c   : > { %v5281_v30 = vpop.f32.mrb[16].mxu1 }
 0x27d   : > { %v5283_v31 = vpop.f32.mrb[17].mxu1 }
 0x280   : > { %v5286_v33 = vpop.f32.mrb[18].mxu1 }
 0x281   : > { %v1505_v34 = vpack.c.bf16 %v5286_v33, %v5281_v30  ;;  %v5290_v35 = vpop.f32.mrb[19].mxu1  ;;  %2128 = vmatmul.mubr.bf16.gmra.mrb[124].mxu1 %v4376_v32  ;;  %v4416_v33 = vld [vmem:[%s5894_s8 + $0xc0] ss:$8 sps:$4 sm:$0xff]  }
 0x282   : > { %v1506_v38 = vpack.c.bf16 %v5290_v35, %v5283_v31  ;;  %2330 = vmatprep.mubr.bf16.mxu1 %v1498_v3  ;;  %v4418_v31 = vld [vmem:[%s5894_s8 + $0xc4] ss:$8 sps:$4 sm:$0xff]  }
 0x284   : > { %v5303_v40 = vpop.f32.mrb[20].mxu1 }
 0x285   : > { %v5308_v42 = vpop.f32.mrb[21].mxu1 }
 0x288   : > { %v5313_v44 = vpop.f32.mrb[22].mxu1 }
 0x289   : > { %v1507_v46 = vpack.c.bf16 %v5313_v44, %v5303_v40  ;;  %v5320_v47 = vpop.f32.mrb[23].mxu1  ;;  %2331 = vmatmul.mubr.bf16.vlgmr.msra.gmra.mrb[64].mxu1 %v1497_v1  ;;  %v4398_v1 = vld [vmem:[%s5894_s8 + $0x60] ss:$8 sps:$4 sm:$0xff]  }
 0x28a   : > { %v1508_v49 = vpack.c.bf16 %v5320_v47, %v5308_v42  ;;  %2340 = vmatprep.mubr.bf16.mxu1 %v1500_v10  ;;  %3962 = vmatpush1.bf16.msra.mxu1 %v4380_v36  ;;  %v4404_v10 = vld [vmem:[%s5894_s8 + $0x80] ss:$8 sps:$4 sm:$0xff]   ;;  %v4421_v36 = vld [vmem:[%s5894_s8 + $0xd4] ss:$8 sps:$4 sm:$0xff]  }
 0x28b   : > { %3947 = vmatprep.subr.bf16.mxu1 %v4385_v39  ;;  %2816 = vmatpush1.bf16.msra.mxu0 %v4398_v1  ;;  %v4419_v39 = vld [vmem:[%s5894_s8 + $0xd0] ss:$8 sps:$4 sm:$0xff]  }
 0x28c   : > { %v5327_v50 = vpop.f32.mrb[24].mxu1  ;;  %2817 = vmatprep.subr.bf16.mxu0 %v4403_v4 }
 0x28d   : > { %v5332_v52 = vpop.f32.mrb[25].mxu1 }
 0x28e   : > { %3963 = vmatpush1.bf16.msra.mxu1 %v4383_v41 }
 0x28f   : > { %3948 = vmatprep.subr.bf16.mxu1 %v4388_v43  ;;  %2818 = vmatpush1.bf16.msra.mxu0 %v4401_v7 }
 0x290   : > { %v5337_v54 = vpop.f32.mrb[26].mxu1 }
 0x291   : > { %v1509_v56 = vpack.c.bf16 %v5337_v54, %v5327_v50  ;;  %v5344_v57 = vpop.f32.mrb[27].mxu1  ;;  %2341 = vmatmul.mubr.bf16.gmra.mrb[68].mxu1 %v1499_v16  ;;  %v4406_v16 = vld [vmem:[%s5894_s8 + $0x84] ss:$8 sps:$4 sm:$0xff]  }
 0x292   : > { %v1510_v59 = vpack.c.bf16 %v5344_v57, %v5332_v52  ;;  %2350 = vmatprep.mubr.bf16.mxu1 %v1502_v20  ;;  %3964 = vmatpush1.bf16.msra.mxu1 %v4386_v45  ;;  %v4412_v20 = vld [vmem:[%s5894_s8 + $0xa4] ss:$8 sps:$4 sm:$0xff]  }
 0x293   : > { %3949 = vmatprep.subr.bf16.mxu1 %v4391_v48  ;;  %2819 = vmatprep.subr.bf16.mxu0 %v4406_v16 }
 0x294   : > { %v5354_v60 = vpop.f32.mrb[28].mxu1  ;;  %2820 = vmatpush1.bf16.msra.mxu0 %v4404_v10 }
 0x295   : > { %v5359_v62 = vpop.f32.mrb[29].mxu1  ;;  %2821 = vmatprep.subr.bf16.mxu0 %v4409_v13 }
 0x296   : > { %3965 = vmatpush1.bf16.msra.mxu1 %v4389_v51 }
 0x297   : > { %3950 = vmatprep.subr.bf16.mxu1 %v4394_v53 }
 0x298   : > { %v5364_v0 = vpop.f32.mrb[30].mxu1 }
 0x299   : > { %v1511_v2 = vpack.c.bf16 %v5364_v0, %v5354_v60  ;;  %v5371_v3 = vpop.f32.mrb[31].mxu1  ;;  %2351 = vmatmul.mubr.bf16.gmra.mrb[72].mxu1 %v1501_v17  ;;  %v4407_v17 = vld [vmem:[%s5894_s8 + $0x90] ss:$8 sps:$4 sm:$0xff]  }
 0x29a   : > { %v1512_v5 = vpack.c.bf16 %v5371_v3, %v5359_v62  ;;  %2360 = vmatprep.mubr.bf16.mxu1 %v1504_v29  ;;  %3966 = vmatpush1.bf16.msra.mxu1 %v4392_v55  ;;  %v4413_v29 = vld [vmem:[%s5894_s8 + $0xb0] ss:$8 sps:$4 sm:$0xff]  }
 0x29b   : > { %3951 = vmatprep.subr.bf16.mxu1 %v4397_v58  ;;  %2822 = vmatpush1.bf16.msra.mxu0 %v4407_v17 }
 0x29c   : > { %v5384_v6 = vpop.f32.mrb[32].mxu1  ;;  %2823 = vmatprep.subr.bf16.mxu0 %v4412_v20 }
 0x29d   : > { %v5389_v8 = vpop.f32.mrb[33].mxu1 }
 0x29e   : > { %3967 = vmatpush1.bf16.msra.mxu1 %v4395_v61 }
 0x29f   : > { %3952 = vmatprep.subr.bf16.mxu1 %v4400_v63  ;;  %2824 = vmatpush1.bf16.msra.mxu0 %v4410_v23 }
 0x2a0   : > { %v5394_v9 = vpop.f32.mrb[34].mxu1  ;;  %2825 = vmatprep.subr.bf16.mxu0 %v4415_v26 }
 0x2a1   : > { %v1513_v11 = vpack.c.bf16 %v5394_v9, %v5384_v6  ;;  %v5401_v12 = vpop.f32.mrb[35].mxu1  ;;  %2361 = vmatmul.mubr.bf16.gmra.mrb[76].mxu1 %v1503_v27  ;;  %v4422_v6 = vld [vmem:[%s5894_s8 + $0xe0] ss:$8 sps:$4 sm:$0xff]  }
 0x2a2   : > { %v1514_v14 = vpack.c.bf16 %v5401_v12, %v5389_v8  ;;  %2370 = vmatprep.mubr.bf16.mxu1 %v1506_v38  ;;  %3968 = vmatpush1.bf16.msra.mxu1 %v4398_v1  ;;  %v4425_v8 = vld [vmem:[%s5894_s8 + $0xf0] ss:$8 sps:$4 sm:$0xff]   ;;  %v4428_v9 = vld [vmem:[%s5896_s10 + $0x40] sm:$0xff]  }
 0x2a3   : > { %3953 = vmatprep.subr.bf16.mxu1 %v4403_v4  ;;  %2826 = vmatpush1.bf16.msra.mxu0 %v4413_v29 }
 0x2a4   : > { %v5414_v15 = vpop.f32.mrb[36].mxu1  ;;  %2827 = vmatprep.subr.bf16.mxu0 %v4418_v31 }
 0x2a5   : > { %v5419_v18 = vpop.f32.mrb[37].mxu1 }
 0x2a6   : > { %3969 = vmatpush1.bf16.msra.mxu1 %v4401_v7  ;;  %v4427_v7 = vld [vmem:[%s5894_s8 + $0xf4] ss:$8 sps:$4 sm:$0xff]  }
 0x2a7   : > { %3954 = vmatprep.subr.bf16.mxu1 %v4406_v16  ;;  %2828 = vmatpush1.bf16.msra.mxu0 %v4416_v33  ;;  %v2491_v16 = vld [vmem:[%s5893_s7] sm:$0x3] }
 0x2a8   : > { %v5424_v22 = vpop.f32.mrb[38].mxu1  ;;  %2829 = vmatprep.subr.bf16.mxu0 %v4421_v36 }
 0x2a9   : > { %v1515_v24 = vpack.c.bf16 %v5424_v22, %v5414_v15  ;;  %v1422_v25 = vpop.f32.mrb[39].mxu1  ;;  %2371 = vmatmul.mubr.bf16.gmra.mrb[80].mxu1 %v1505_v34 }
 0x2aa   : > { %v1516_v27 = vpack.c.bf16 %v1422_v25, %v5419_v18  ;;  %2380 = vmatprep.mubr.bf16.mxu1 %v1508_v49  ;;  %3970 = vmatpush1.bf16.msra.mxu1 %v4404_v10  ;;  %v5502_v10 = vrot.slane %v2491_v16, %v4849_v19  ;;  %v4429_v25 = vld [vmem:[%s5896_s10] sm:$0xff]  }
 0x2ab   : > { %3955 = vmatprep.subr.bf16.mxu1 %v4409_v13  ;;  %2830 = vmatpush1.bf16.msra.mxu0 %v4419_v39 }
 0x2ac   : > { %v5441_v28 = vpop.f32.mrb[40].mxu1 }
 0x2ad   : > { %v1428_v30 = vpop.f32.mrb[41].mxu1 }
 0x2ae   : > { %3971 = vmatpush1.bf16.msra.mxu1 %v4407_v17 }
 0x2af   : > { %3956 = vmatprep.subr.bf16.mxu1 %v4412_v20 }
 0x2b0   : > { %v1432_v32 = vpop.f32.mrb[42].mxu1 }
 0x2b1   : > { %v1517_v34 = vpack.c.bf16 %v1432_v32, %v5441_v28  ;;  %v1434_v35 = vpop.f32.mrb[43].mxu1  ;;  %2381 = vmatmul.mubr.bf16.gmra.mrb[84].mxu1 %v1507_v46 }
 0x2b2   : > { %v1518_v37 = vpack.c.bf16 %v1434_v35, %v1428_v30  ;;  %2390 = vmatprep.mubr.bf16.mxu1 %v1510_v59  ;;  %3972 = vmatpush1.bf16.msra.mxu1 %v4410_v23  ;;  %v4431_v30 = vld [vmem:[%s5896_s10 + $0x8] sm:$0xff]  }
 0x2b3   : > { %3957 = vmatprep.subr.bf16.mxu1 %v4415_v26  ;;  %v4430_v26 = vld [vmem:[%s5896_s10 + $0x48] sm:$0xff]  }
 0x2b4   : > { %v1438_v38 = vpop.f32.mrb[44].mxu1 }
 0x2b5   : > { %v1440_v40 = vpop.f32.mrb[45].mxu1 }
 0x2b6   : > { %3973 = vmatpush1.bf16.msra.mxu1 %v4413_v29 }
 0x2b7   : > { %3958 = vmatprep.subr.bf16.mxu1 %v4418_v31 }
 0x2b8   : > { %v1444_v41 = vpop.f32.mrb[46].mxu1 }
 0x2b9   : > { %v1519_v42 = vpack.c.bf16 %v1444_v41, %v1438_v38  ;;  %v1446_v43 = vpop.f32.mrb[47].mxu1  ;;  %2391 = vmatmul.mubr.bf16.gmra.mrb[88].mxu1 %v1509_v56 }
 0x2ba   : > { %v1520_v44 = vpack.c.bf16 %v1446_v43, %v1440_v40  ;;  %2400 = vmatprep.mubr.bf16.mxu1 %v1512_v5  ;;  %3974 = vmatpush1.bf16.msra.mxu1 %v4416_v33  ;;  %v4424_v5 = vld [vmem:[%s5894_s8 + $0xe4] ss:$8 sps:$4 sm:$0xff]   ;;  %v4434_v40 = vld [vmem:[%s5896_s10 + $0x58] sm:$0xff]  }
 0x2bb   : > { %3959 = vmatprep.subr.bf16.mxu1 %v4421_v36  ;;  %2831 = vmatprep.subr.bf16.mxu0 %v4424_v5 }
 0x2bc   : > { %v1450_v45 = vpop.f32.mrb[48].mxu1  ;;  %2832 = vmatpush1.bf16.msra.mxu0 %v4422_v6 }
 0x2bd   : > { %v1452_v46 = vpop.f32.mrb[49].mxu1  ;;  %2833 = vmatprep.subr.bf16.mxu0 %v4427_v7 }
 0x2be   : > { %3975 = vmatpush1.bf16.msra.mxu1 %v4419_v39  ;;  %v4433_v39 = vld [vmem:[%s5896_s10 + $0x10] sm:$0xff]  }
 0x2bf   : > { %3960 = vmatprep.subr.bf16.mxu1 %v4424_v5 }
 0x2c0   : > { %v1456_v47 = vpop.f32.mrb[50].mxu1  ;;  %2834 = vmatpush1.bf16.msra.mxu0 %v4425_v8 }
 0x2c1   : > { %v1521_v48 = vpack.c.bf16 %v1456_v47, %v1450_v45  ;;  %v1458_v49 = vpop.f32.mrb[51].mxu1  ;;  %2401 = vmatmul.mubr.bf16.gmra.mrb[92].mxu1 %v1511_v2  ;;  %3818 = vmatprep.subr.bf16.mxu0 %v4428_v9 }
 0x2c2   : > { %v1522_v51 = vpack.c.bf16 %v1458_v49, %v1452_v46  ;;  %2410 = vmatprep.mubr.bf16.mxu1 %v1514_v14  ;;  %3976 = vmatpush1.bf16.msra.mxu1 %v4422_v6 }
 0x2c3   : > { %3961 = vmatprep.subr.bf16.mxu1 %v4427_v7 }
 0x2c4   : > { %v1462_v50 = vpop.f32.mrb[52].mxu1 }
 0x2c5   : > { %v1464_v52 = vpop.f32.mrb[53].mxu1 }
 0x2c6   : > { %3977 = vmatpush1.bf16.msra.mxu1 %v4425_v8  ;;  %v4443_v8 = vld [vmem:[%s5896_s10 + $0x38] sm:$0xff]  }
 0x2c8   : > { %v1468_v53 = vpop.f32.mrb[54].mxu1 }
 0x2c9   : > { %v1523_v54 = vpack.c.bf16 %v1468_v53, %v1462_v50  ;;  %v1470_v55 = vpop.f32.mrb[55].mxu1  ;;  %2411 = vmatmul.mubr.bf16.gmra.mrb[96].mxu1 %v1513_v11  ;;  %v5505_v11 = vrot.slane %v2491_v16, %v4854_v21  ;;  %v4437_v53 = vld [vmem:[%s5896_s10 + $0x20] sm:$0xff]  }
 0x2ca   : > { %v1524_v56 = vpack.c.bf16 %v1470_v55, %v1464_v52  ;;  %2420 = vmatprep.mubr.bf16.mxu1 %v1516_v27 }
 0x2cc   : > { %v1474_v57 = vpop.f32.mrb[56].mxu1 }
 0x2cd   : > { %v1476_v58 = vpop.f32.mrb[57].mxu1 }
 0x2d0   : > { %v1480_v59 = vpop.f32.mrb[58].mxu1 }
 0x2d1   : > { %v1525_v60 = vpack.c.bf16 %v1480_v59, %v1474_v57  ;;  %v1482_v61 = vpop.f32.mrb[59].mxu1  ;;  %2421 = vmatmul.mubr.bf16.gmra.mrb[100].mxu1 %v1515_v24 }
 0x2d2   : > { %v1526_v62 = vpack.c.bf16 %v1482_v61, %v1476_v58  ;;  %2430 = vmatprep.mubr.bf16.mxu1 %v1518_v37  ;;  %v4439_v58 = vld [vmem:[%s5896_s10 + $0x28] sm:$0xff]  }
 0x2d4   : > { %v1486_v63 = vpop.f32.mrb[60].mxu1 }
 0x2d5   : > { %v1488_v0 = vpop.f32.mrb[61].mxu1 }
 0x2d8   : > { %v1492_v1 = vpop.f32.mrb[62].mxu1 }
 0x2d9   : > { %v1527_v2 = vpack.c.bf16 %v1492_v1, %v1486_v63  ;;  %v1494_v3 = vpop.f32.mrb[63].mxu1  ;;  %2431 = vmatmul.mubr.bf16.gmra.mrb[104].mxu1 %v1517_v34  ;;  %v4432_v34 = vld [vmem:[%s5896_s10 + $0x50] sm:$0xff]  }
 0x2da   : > { %v1528_v4 = vpack.c.bf16 %v1494_v3, %v1488_v0  ;;  %2440 = vmatprep.mubr.bf16.mxu1 %v1520_v44  ;;  %v4435_v44 = vld [vmem:[%s5896_s10 + $0x18] sm:$0xff]   ;;  %v4441_v3 = vld [vmem:[%s5896_s10 + $0x30] sm:$0xff]  }
 0x2e1   : > { %2441 = vmatmul.mubr.bf16.gmra.mrb[108].mxu1 %v1519_v42 }
 0x2e2   : > { %2450 = vmatprep.mubr.bf16.mxu1 %v1522_v51 }
 0x2e9   : > { %2451 = vmatmul.mubr.bf16.gmra.mrb[112].mxu1 %v1521_v48  ;;  %v4436_v48 = vld [vmem:[%s5896_s10 + $0x60] sm:$0xff]  }
 0x2ea   : > { %2460 = vmatprep.mubr.bf16.mxu1 %v1524_v56 }
 0x2f1   : > { %2461 = vmatmul.mubr.bf16.gmra.mrb[116].mxu1 %v1523_v54  ;;  %v4438_v54 = vld [vmem:[%s5896_s10 + $0x68] sm:$0xff]  }
 0x2f2   : > { %2470 = vmatprep.mubr.bf16.mxu1 %v1526_v62  ;;  %v4440_v62 = vld [vmem:[%s5896_s10 + $0x70] sm:$0xff]  }
 0x2f9   : > { %2471 = vmatmul.mubr.bf16.gmra.mrb[120].mxu1 %v1525_v60 }
 0x2fa   : > { %2480 = vmatprep.mubr.bf16.mxu1 %v1528_v4  ;;  %v4442_v4 = vld [vmem:[%s5896_s10 + $0x78] sm:$0xff]  }
 0x301   : > { %2481 = vmatmul.mubr.bf16.gmra.mrb[124].mxu1 %v1527_v2 }
 0x35c   : > { %v2332_v12 = vpop.f32.mrb[64].mxu1 }
 0x35d   : > { %v2334_v13 = vpop.f32.mrb[65].mxu1  ;;  %v2503_v15 = vadd.f32 %v5502_v10, %v2332_v12 }
 0x35e   : > { %v2336_v14 = vpop.f32.mrb[66].mxu1  ;;  %v2504_v20 = vadd.f32 %v5505_v11, %v2334_v13 }
 0x35f   : > { %v2505_v17 = vadd.f32 %v5502_v10, %v2336_v14  ;;  %v2338_v18 = vpop.f32.mrb[67].mxu1 }
 0x360   : > { %v2506_v22 = vadd.f32 %v5505_v11, %v2338_v18 }
 0x361   : > { %v2567_v23 = vpack.c.bf16 %v2505_v17, %v2503_v15 }
 0x362   : > { %v2568_v24 = vpack.c.bf16 %v2506_v22, %v2504_v20 }
 0x364   : > { %v2342_v27 = vpop.f32.mrb[68].mxu1  ;;  %2835 = vmatprep.mubr.bf16.mxu0 %v2568_v24 }
 0x365   : > { %v2344_v28 = vpop.f32.mrb[69].mxu1  ;;  %2836 = vmatmul.mubr.bf16.vlgmr.msra.gmra.mrb[16].mxu0 %v2567_v23  ;;  %v2507_v31 = vadd.f32 %v5502_v10, %v2342_v27 }
 0x366   : > { %v2346_v29 = vpop.f32.mrb[70].mxu1  ;;  %3819 = vmatpush3.bf16.msra.mxu0 %v4429_v25  ;;  %v2508_v35 = vadd.f32 %v5505_v11, %v2344_v28 }
 0x367   : > { %v2509_v32 = vadd.f32 %v5502_v10, %v2346_v29  ;;  %v2348_v33 = vpop.f32.mrb[71].mxu1  ;;  %3820 = vmatprep.subr.bf16.mxu0 %v4430_v26 }
 0x368   : > { %v2510_v36 = vadd.f32 %v5505_v11, %v2348_v33 }
 0x369   : > { %v2569_v37 = vpack.c.bf16 %v2509_v32, %v2507_v31 }
 0x36a   : > { %v2570_v38 = vpack.c.bf16 %v2510_v36, %v2508_v35  ;;  %3821 = vmatpush3.bf16.msra.mxu0 %v4431_v30 }
 0x36b   : > { %3822 = vmatprep.subr.bf16.mxu0 %v4432_v34 }
 0x36c   : > { %v2352_v41 = vpop.f32.mrb[72].mxu1  ;;  %2845 = vmatprep.mubr.bf16.mxu0 %v2570_v38 }
 0x36d   : > { %v2354_v42 = vpop.f32.mrb[73].mxu1  ;;  %2846 = vmatmul.mubr.bf16.gmra.mrb[20].mxu0 %v2569_v37  ;;  %v2511_v45 = vadd.f32 %v5502_v10, %v2352_v41 }
 0x36e   : > { %v2356_v43 = vpop.f32.mrb[74].mxu1  ;;  %3823 = vmatpush3.bf16.msra.mxu0 %v4433_v39  ;;  %v2512_v49 = vadd.f32 %v5505_v11, %v2354_v42 }
 0x36f   : > { %v2513_v46 = vadd.f32 %v5502_v10, %v2356_v43  ;;  %v2358_v47 = vpop.f32.mrb[75].mxu1  ;;  %3824 = vmatprep.subr.bf16.mxu0 %v4434_v40 }
 0x370   : > { %v2514_v51 = vadd.f32 %v5505_v11, %v2358_v47 }
 0x371   : > { %v2571_v50 = vpack.c.bf16 %v2513_v46, %v2511_v45 }
 0x372   : > { %v2572_v52 = vpack.c.bf16 %v2514_v51, %v2512_v49  ;;  %3825 = vmatpush3.bf16.msra.mxu0 %v4435_v44 }
 0x373   : > { %3826 = vmatprep.subr.bf16.mxu0 %v4436_v48 }
 0x374   : > { %v2362_v55 = vpop.f32.mrb[76].mxu1  ;;  %2855 = vmatprep.mubr.bf16.mxu0 %v2572_v52 }
 0x375   : > { %v2364_v56 = vpop.f32.mrb[77].mxu1  ;;  %2856 = vmatmul.mubr.bf16.gmra.mrb[24].mxu0 %v2571_v50  ;;  %v2515_v59 = vadd.f32 %v5502_v10, %v2362_v55 }
 0x376   : > { %v2366_v57 = vpop.f32.mrb[78].mxu1  ;;  %3827 = vmatpush3.bf16.msra.mxu0 %v4437_v53  ;;  %v2516_v63 = vadd.f32 %v5505_v11, %v2364_v56 }
 0x377   : > { %v2517_v60 = vadd.f32 %v5502_v10, %v2366_v57  ;;  %v2368_v61 = vpop.f32.mrb[79].mxu1  ;;  %3828 = vmatprep.subr.bf16.mxu0 %v4438_v54 }
 0x378   : > { %v2518_v0 = vadd.f32 %v5505_v11, %v2368_v61 }
 0x379   : > { %v2573_v1 = vpack.c.bf16 %v2517_v60, %v2515_v59 }
 0x37a   : > { %v2574_v2 = vpack.c.bf16 %v2518_v0, %v2516_v63  ;;  %3829 = vmatpush3.bf16.msra.mxu0 %v4439_v58 }
 0x37b   : > { %3830 = vmatprep.subr.bf16.mxu0 %v4440_v62 }
 0x37c   : > { %v2372_v5 = vpop.f32.mrb[80].mxu1  ;;  %2865 = vmatprep.mubr.bf16.mxu0 %v2574_v2 }
 0x37d   : > { %v2374_v6 = vpop.f32.mrb[81].mxu1  ;;  %2866 = vmatmul.mubr.bf16.gmra.mrb[28].mxu0 %v2573_v1  ;;  %v2519_v16 = vadd.f32 %v5502_v10, %v2372_v5 }
 0x37e   : > { %v2376_v7 = vpop.f32.mrb[82].mxu1  ;;  %3831 = vmatpush3.bf16.msra.mxu0 %v4441_v3  ;;  %v2520_v13 = vadd.f32 %v5505_v11, %v2374_v6 }
 0x37f   : > { %v2521_v9 = vadd.f32 %v5502_v10, %v2376_v7  ;;  %v2378_v12 = vpop.f32.mrb[83].mxu1  ;;  %3832 = vmatprep.subr.bf16.mxu0 %v4442_v4 }
 0x380   : > { %v2522_v14 = vadd.f32 %v5505_v11, %v2378_v12 }
 0x381   : > { %v2575_v15 = vpack.c.bf16 %v2521_v9, %v2519_v16 }
 0x382   : > { %v2576_v17 = vpack.c.bf16 %v2522_v14, %v2520_v13  ;;  %3833 = vmatpush3.bf16.msra.mxu0 %v4443_v8 }
 0x384   : > { %v2382_v18 = vpop.f32.mrb[84].mxu1  ;;  %2875 = vmatprep.mubr.bf16.mxu0 %v2576_v17 }
 0x385   : > { %v2384_v20 = vpop.f32.mrb[85].mxu1  ;;  %2876 = vmatmul.mubr.bf16.gmra.mrb[32].mxu0 %v2575_v15  ;;  %v2523_v23 = vadd.f32 %v5502_v10, %v2382_v18 }
 0x386   : > { %v2386_v22 = vpop.f32.mrb[86].mxu1  ;;  %v2524_v26 = vadd.f32 %v5505_v11, %v2384_v20 }
 0x387   : > { %v2525_v24 = vadd.f32 %v5502_v10, %v2386_v22  ;;  %v2388_v25 = vpop.f32.mrb[87].mxu1 }
 0x388   : > { %v2526_v27 = vadd.f32 %v5505_v11, %v2388_v25 }
 0x389   : > { %v2577_v28 = vpack.c.bf16 %v2525_v24, %v2523_v23 }
 0x38a   : > { %v2578_v29 = vpack.c.bf16 %v2526_v27, %v2524_v26 }
 0x38c   : > { %v2392_v30 = vpop.f32.mrb[88].mxu1  ;;  %2885 = vmatprep.mubr.bf16.mxu0 %v2578_v29 }
 0x38d   : > { %v2394_v31 = vpop.f32.mrb[89].mxu1  ;;  %2886 = vmatmul.mubr.bf16.gmra.mrb[36].mxu0 %v2577_v28  ;;  %v2527_v33 = vadd.f32 %v5502_v10, %v2392_v30 }
 0x38e   : > { %v2396_v32 = vpop.f32.mrb[90].mxu1  ;;  %v2528_v36 = vadd.f32 %v5505_v11, %v2394_v31 }
 0x38f   : > { %v2529_v34 = vadd.f32 %v5502_v10, %v2396_v32  ;;  %v2398_v35 = vpop.f32.mrb[91].mxu1 }
 0x390   : > { %v2530_v37 = vadd.f32 %v5505_v11, %v2398_v35 }
 0x391   : > { %v2579_v38 = vpack.c.bf16 %v2529_v34, %v2527_v33 }
 0x392   : > { %v2580_v39 = vpack.c.bf16 %v2530_v37, %v2528_v36 }
 0x394   : > { %v2402_v40 = vpop.f32.mrb[92].mxu1  ;;  %2895 = vmatprep.mubr.bf16.mxu0 %v2580_v39 }
 0x395   : > { %v2404_v41 = vpop.f32.mrb[93].mxu1  ;;  %2896 = vmatmul.mubr.bf16.gmra.mrb[40].mxu0 %v2579_v38  ;;  %v2531_v43 = vadd.f32 %v5502_v10, %v2402_v40 }
 0x396   : > { %v2406_v42 = vpop.f32.mrb[94].mxu1  ;;  %v2532_v46 = vadd.f32 %v5505_v11, %v2404_v41 }
 0x397   : > { %v2533_v44 = vadd.f32 %v5502_v10, %v2406_v42  ;;  %v2408_v45 = vpop.f32.mrb[95].mxu1 }
 0x398   : > { %v2534_v47 = vadd.f32 %v5505_v11, %v2408_v45 }
 0x399   : > { %v2581_v48 = vpack.c.bf16 %v2533_v44, %v2531_v43 }
 0x39a   : > { %v2582_v49 = vpack.c.bf16 %v2534_v47, %v2532_v46 }
 0x39c   : > { %v2412_v51 = vpop.f32.mrb[96].mxu1  ;;  %2905 = vmatprep.mubr.bf16.mxu0 %v2582_v49 }
 0x39d   : > { %v2414_v50 = vpop.f32.mrb[97].mxu1  ;;  %2906 = vmatmul.mubr.bf16.gmra.mrb[44].mxu0 %v2581_v48  ;;  %v2535_v53 = vadd.f32 %v5502_v10, %v2412_v51 }
 0x39e   : > { %v2416_v52 = vpop.f32.mrb[98].mxu1  ;;  %v2536_v56 = vadd.f32 %v5505_v11, %v2414_v50 }
 0x39f   : > { %v2537_v54 = vadd.f32 %v5502_v10, %v2416_v52  ;;  %v2418_v55 = vpop.f32.mrb[99].mxu1 }
 0x3a0   : > { %v2538_v57 = vadd.f32 %v5505_v11, %v2418_v55 }
 0x3a1   : > { %v2583_v58 = vpack.c.bf16 %v2537_v54, %v2535_v53 }
 0x3a2   : > { %v2584_v59 = vpack.c.bf16 %v2538_v57, %v2536_v56 }
 0x3a4   : > { %v2422_v60 = vpop.f32.mrb[100].mxu1  ;;  %2915 = vmatprep.mubr.bf16.mxu0 %v2584_v59 }
 0x3a5   : > { %v2424_v61 = vpop.f32.mrb[101].mxu1  ;;  %2916 = vmatmul.mubr.bf16.gmra.mrb[48].mxu0 %v2583_v58  ;;  %v2539_v63 = vadd.f32 %v5502_v10, %v2422_v60 }
 0x3a6   : > { %v2426_v62 = vpop.f32.mrb[102].mxu1  ;;  %v2540_v2 = vadd.f32 %v5505_v11, %v2424_v61 }
 0x3a7   : > { %v2541_v0 = vadd.f32 %v5502_v10, %v2426_v62  ;;  %v2428_v1 = vpop.f32.mrb[103].mxu1 }
 0x3a8   : > { %v2542_v3 = vadd.f32 %v5505_v11, %v2428_v1 }
 0x3a9   : > { %v2585_v4 = vpack.c.bf16 %v2541_v0, %v2539_v63 }
 0x3aa   : > { %v2586_v5 = vpack.c.bf16 %v2542_v3, %v2540_v2 }
 0x3ac   : > { %v2432_v6 = vpop.f32.mrb[104].mxu1  ;;  %2925 = vmatprep.mubr.bf16.mxu0 %v2586_v5 }
 0x3ad   : > { %v2434_v7 = vpop.f32.mrb[105].mxu1  ;;  %2926 = vmatmul.mubr.bf16.gmra.mrb[52].mxu0 %v2585_v4  ;;  %v2543_v16 = vadd.f32 %v5502_v10, %v2432_v6  ;;  %v2631_v6 = vld [vmem:[%s5895_s9] sm:$0x3] }
 0x3ae   : > { %v2436_v8 = vpop.f32.mrb[106].mxu1  ;;  %v2544_v13 = vadd.f32 %v5505_v11, %v2434_v7  ;;  %v5621_v7 = vrot.slane %v2631_v6, %v4849_v19 }
 0x3af   : > { %v2545_v9 = vadd.f32 %v5502_v10, %v2436_v8  ;;  %v2438_v12 = vpop.f32.mrb[107].mxu1 }
 0x3b0   : > { %v2546_v14 = vadd.f32 %v5505_v11, %v2438_v12 }
 0x3b1   : > { %v2587_v15 = vpack.c.bf16 %v2545_v9, %v2543_v16 }
 0x3b2   : > { %v2588_v17 = vpack.c.bf16 %v2546_v14, %v2544_v13 }
 0x3b4   : > { %v2442_v18 = vpop.f32.mrb[108].mxu1  ;;  %2935 = vmatprep.mubr.bf16.mxu0 %v2588_v17 }
 0x3b5   : > { %v2444_v20 = vpop.f32.mrb[109].mxu1  ;;  %2936 = vmatmul.mubr.bf16.gmra.mrb[56].mxu0 %v2587_v15  ;;  %v2547_v23 = vadd.f32 %v5502_v10, %v2442_v18 }
 0x3b6   : > { %v2446_v22 = vpop.f32.mrb[110].mxu1  ;;  %v2548_v26 = vadd.f32 %v5505_v11, %v2444_v20 }
 0x3b7   : > { %v2549_v24 = vadd.f32 %v5502_v10, %v2446_v22  ;;  %v2448_v25 = vpop.f32.mrb[111].mxu1 }
 0x3b8   : > { %v2550_v27 = vadd.f32 %v5505_v11, %v2448_v25 }
 0x3b9   : > { %v2589_v28 = vpack.c.bf16 %v2549_v24, %v2547_v23 }
 0x3ba   : > { %v2590_v29 = vpack.c.bf16 %v2550_v27, %v2548_v26 }
 0x3bc   : > { %v2452_v30 = vpop.f32.mrb[112].mxu1  ;;  %2945 = vmatprep.mubr.bf16.mxu0 %v2590_v29 }
 0x3bd   : > { %v2454_v31 = vpop.f32.mrb[113].mxu1  ;;  %2946 = vmatmul.mubr.bf16.gmra.mrb[60].mxu0 %v2589_v28  ;;  %v2551_v33 = vadd.f32 %v5502_v10, %v2452_v30 }
 0x3be   : > { %v2456_v32 = vpop.f32.mrb[114].mxu1  ;;  %v2552_v36 = vadd.f32 %v5505_v11, %v2454_v31 }
 0x3bf   : > { %v2553_v34 = vadd.f32 %v5502_v10, %v2456_v32  ;;  %v2458_v35 = vpop.f32.mrb[115].mxu1 }
 0x3c0   : > { %v2554_v37 = vadd.f32 %v5505_v11, %v2458_v35 }
 0x3c1   : > { %v2591_v38 = vpack.c.bf16 %v2553_v34, %v2551_v33 }
 0x3c2   : > { %v2592_v39 = vpack.c.bf16 %v2554_v37, %v2552_v36 }
 0x3c4   : > { %v2462_v40 = vpop.f32.mrb[116].mxu1  ;;  %2955 = vmatprep.mubr.bf16.mxu0 %v2592_v39 }
 0x3c5   : > { %v2464_v41 = vpop.f32.mrb[117].mxu1  ;;  %2956 = vmatmul.mubr.bf16.gmra.mrb[64].mxu0 %v2591_v38  ;;  %v2555_v43 = vadd.f32 %v5502_v10, %v2462_v40 }
 0x3c6   : > { %v2466_v42 = vpop.f32.mrb[118].mxu1  ;;  %v2556_v46 = vadd.f32 %v5505_v11, %v2464_v41 }
 0x3c7   : > { %v2557_v44 = vadd.f32 %v5502_v10, %v2466_v42  ;;  %v2468_v45 = vpop.f32.mrb[119].mxu1 }
 0x3c8   : > { %v2558_v47 = vadd.f32 %v5505_v11, %v2468_v45 }
 0x3c9   : > { %v2593_v48 = vpack.c.bf16 %v2557_v44, %v2555_v43 }
 0x3ca   : > { %v2594_v49 = vpack.c.bf16 %v2558_v47, %v2556_v46 }
 0x3cc   : > { %v2472_v51 = vpop.f32.mrb[120].mxu1  ;;  %2965 = vmatprep.mubr.bf16.mxu1 %v2594_v49 }
 0x3cd   : > { %v2474_v50 = vpop.f32.mrb[121].mxu1  ;;  %2966 = vmatmul.mubr.bf16.vlgmr.msra.gmra.mrb[128].mxu1 %v2593_v48  ;;  %v2559_v53 = vadd.f32 %v5502_v10, %v2472_v51 }
 0x3ce   : > { %v2476_v52 = vpop.f32.mrb[122].mxu1  ;;  %v2560_v56 = vadd.f32 %v5505_v11, %v2474_v50 }
 0x3cf   : > { %v2561_v54 = vadd.f32 %v5502_v10, %v2476_v52  ;;  %v2478_v55 = vpop.f32.mrb[123].mxu1 }
 0x3d0   : > { %v2562_v57 = vadd.f32 %v5505_v11, %v2478_v55 }
 0x3d1   : > { %v2595_v58 = vpack.c.bf16 %v2561_v54, %v2559_v53 }
 0x3d2   : > { %v2596_v59 = vpack.c.bf16 %v2562_v57, %v2560_v56 }
 0x3d4   : > { %v2482_v60 = vpop.f32.mrb[124].mxu1  ;;  %2975 = vmatprep.mubr.bf16.mxu1 %v2596_v59 }
 0x3d5   : > { %v2484_v61 = vpop.f32.mrb[125].mxu1  ;;  %2976 = vmatmul.mubr.bf16.gmra.mrb[132].mxu1 %v2595_v58  ;;  %v2563_v63 = vadd.f32 %v5502_v10, %v2482_v60 }
 0x3d6   : > { %v2486_v62 = vpop.f32.mrb[126].mxu1  ;;  %v2564_v2 = vadd.f32 %v5505_v11, %v2484_v61 }
 0x3d7   : > { %v2565_v0 = vadd.f32 %v5502_v10, %v2486_v62  ;;  %v2488_v1 = vpop.f32.mrb[127].mxu1  ;;  %v5626_v10 = vrot.slane %v2631_v6, %v4854_v21 }
 0x3d8   : > { %v2566_v3 = vadd.f32 %v5505_v11, %v2488_v1 }
 0x3d9   : > { %v2597_v4 = vpack.c.bf16 %v2565_v0, %v2563_v63 }
 0x3da   : > { %v2598_v5 = vpack.c.bf16 %v2566_v3, %v2564_v2 }
 0x3dc   : > { %2985 = vmatprep.mubr.bf16.mxu1 %v2598_v5 }
 0x3dd   : > { %2986 = vmatmul.mubr.bf16.gmra.mrb[136].mxu1 %v2597_v4 }
 0x438   : > { %v2837_v8 = vpop.f32.mrb[16].mxu0 }
 0x439   : > { %v2838_v11 = vadd.f32 %v2837_v8, %v5621_v7  ;;  %v2839_v16 = vpop.f32.mrb[17].mxu0 }
 0x43a   : > { %v2840_v9 = vadd.f32 %v2839_v16, %v5626_v10  ;;  %v2841_v12 = vpop.f32.mrb[18].mxu0 }
 0x43b   : > { %2996 = vst [vmem:[%s5630_s0] sm:$0xff] %v2838_v11  ;;  %v2842_v19 = vadd.f32 %v2841_v12, %v5621_v7  ;;  %v2843_v13 = vpop.f32.mrb[19].mxu0 }
 0x43c   : > { %2997 = vst [vmem:[%s5630_s0 + $0x8] sm:$0xff] %v2840_v9  ;;  %v2844_v21 = vadd.f32 %v2843_v13, %v5626_v10 }
 0x43d   : > { %2998 = vst [vmem:[%s5630_s0 + $0x10] sm:$0xff] %v2842_v19  ;;  %v3060_v14 = vpack.c.bf16 %v2842_v19, %v2838_v11 }
 0x43e   : > { %2999 = vst [vmem:[%s5630_s0 + $0x18] sm:$0xff] %v2844_v21  ;;  %v3061_v15 = vpack.c.bf16 %v2844_v21, %v2840_v9 }
 0x440   : > { %v2847_v17 = vpop.f32.mrb[20].mxu0  ;;  %3259 = vmatprep.mubr.bf16.mxu0 %v3061_v15 }
 0x441   : > { %v2848_v18 = vadd.f32 %v2847_v17, %v5621_v7  ;;  %v2849_v20 = vpop.f32.mrb[21].mxu0  ;;  %3260 = vmatmul.mubr.bf16.vlgmr.msra.gmra.mrb[68].mxu0 %v3060_v14 }
 0x442   : > { %v2850_v22 = vadd.f32 %v2849_v20, %v5626_v10  ;;  %v2851_v23 = vpop.f32.mrb[22].mxu0 }
 0x443   : > { %3000 = vst [vmem:[%s5630_s0 + $0x20] sm:$0xff] %v2848_v18  ;;  %v2852_v24 = vadd.f32 %v2851_v23, %v5621_v7  ;;  %v2853_v25 = vpop.f32.mrb[23].mxu0 }
 0x444   : > { %3001 = vst [vmem:[%s5630_s0 + $0x28] sm:$0xff] %v2850_v22  ;;  %v2854_v26 = vadd.f32 %v2853_v25, %v5626_v10 }
 0x445   : > { %3002 = vst [vmem:[%s5630_s0 + $0x30] sm:$0xff] %v2852_v24  ;;  %v3062_v27 = vpack.c.bf16 %v2852_v24, %v2848_v18 }
 0x446   : > { %3003 = vst [vmem:[%s5630_s0 + $0x38] sm:$0xff] %v2854_v26  ;;  %v3063_v28 = vpack.c.bf16 %v2854_v26, %v2850_v22 }
 0x448   : > { %v2857_v29 = vpop.f32.mrb[24].mxu0  ;;  %3267 = vmatprep.mubr.bf16.mxu0 %v3063_v28 }
 0x449   : > { %v2858_v30 = vadd.f32 %v2857_v29, %v5621_v7  ;;  %v2859_v31 = vpop.f32.mrb[25].mxu0  ;;  %3268 = vmatmul.mubr.bf16.gmra.mrb[72].mxu0 %v3062_v27 }
 0x44a   : > { %v2860_v32 = vadd.f32 %v2859_v31, %v5626_v10  ;;  %v2861_v33 = vpop.f32.mrb[26].mxu0 }
 0x44b   : > { %3004 = vst [vmem:[%s5630_s0 + $0x40] sm:$0xff] %v2858_v30  ;;  %v2862_v34 = vadd.f32 %v2861_v33, %v5621_v7  ;;  %v2863_v35 = vpop.f32.mrb[27].mxu0 }
 0x44c   : > { %3005 = vst [vmem:[%s5630_s0 + $0x48] sm:$0xff] %v2860_v32  ;;  %v2864_v36 = vadd.f32 %v2863_v35, %v5626_v10 }
 0x44d   : > { %3006 = vst [vmem:[%s5630_s0 + $0x50] sm:$0xff] %v2862_v34  ;;  %v3064_v37 = vpack.c.bf16 %v2862_v34, %v2858_v30 }
 0x44e   : > { %3007 = vst [vmem:[%s5630_s0 + $0x58] sm:$0xff] %v2864_v36  ;;  %v3065_v38 = vpack.c.bf16 %v2864_v36, %v2860_v32 }
 0x450   : > { %v2867_v39 = vpop.f32.mrb[28].mxu0  ;;  %3275 = vmatprep.mubr.bf16.mxu0 %v3065_v38 }
 0x451   : > { %v2868_v40 = vadd.f32 %v2867_v39, %v5621_v7  ;;  %v2869_v41 = vpop.f32.mrb[29].mxu0  ;;  %3276 = vmatmul.mubr.bf16.gmra.mrb[76].mxu0 %v3064_v37 }
 0x452   : > { %v2870_v42 = vadd.f32 %v2869_v41, %v5626_v10  ;;  %v2871_v43 = vpop.f32.mrb[30].mxu0 }
 0x453   : > { %3008 = vst [vmem:[%s5630_s0 + $0x60] sm:$0xff] %v2868_v40  ;;  %v2872_v44 = vadd.f32 %v2871_v43, %v5621_v7  ;;  %v2873_v45 = vpop.f32.mrb[31].mxu0 }
 0x454   : > { %3009 = vst [vmem:[%s5630_s0 + $0x68] sm:$0xff] %v2870_v42  ;;  %v2874_v46 = vadd.f32 %v2873_v45, %v5626_v10 }
 0x455   : > { %3010 = vst [vmem:[%s5630_s0 + $0x70] sm:$0xff] %v2872_v44  ;;  %v3066_v47 = vpack.c.bf16 %v2872_v44, %v2868_v40 }
 0x456   : > { %3011 = vst [vmem:[%s5630_s0 + $0x78] sm:$0xff] %v2874_v46  ;;  %v3067_v48 = vpack.c.bf16 %v2874_v46, %v2870_v42 }
 0x458   : > { %v2877_v49 = vpop.f32.mrb[32].mxu0  ;;  %3283 = vmatprep.mubr.bf16.mxu0 %v3067_v48 }
 0x459   : > { %v2878_v51 = vadd.f32 %v2877_v49, %v5621_v7  ;;  %v2879_v50 = vpop.f32.mrb[33].mxu0  ;;  %3284 = vmatmul.mubr.bf16.gmra.mrb[80].mxu0 %v3066_v47 }
 0x45a   : > { %v2880_v52 = vadd.f32 %v2879_v50, %v5626_v10  ;;  %v2881_v53 = vpop.f32.mrb[34].mxu0 }
 0x45b   : > { %3012 = vst [vmem:[%s5630_s0 + $0x80] sm:$0xff] %v2878_v51  ;;  %v2882_v54 = vadd.f32 %v2881_v53, %v5621_v7  ;;  %v2883_v55 = vpop.f32.mrb[35].mxu0 }
 0x45c   : > { %3013 = vst [vmem:[%s5630_s0 + $0x88] sm:$0xff] %v2880_v52  ;;  %v2884_v56 = vadd.f32 %v2883_v55, %v5626_v10 }
 0x45d   : > { %3014 = vst [vmem:[%s5630_s0 + $0x90] sm:$0xff] %v2882_v54  ;;  %v3068_v57 = vpack.c.bf16 %v2882_v54, %v2878_v51 }
 0x45e   : > { %3015 = vst [vmem:[%s5630_s0 + $0x98] sm:$0xff] %v2884_v56  ;;  %v3069_v58 = vpack.c.bf16 %v2884_v56, %v2880_v52 }
 0x460   : > { %v2887_v59 = vpop.f32.mrb[36].mxu0  ;;  %3291 = vmatprep.mubr.bf16.mxu0 %v3069_v58 }
 0x461   : > { %v2888_v60 = vadd.f32 %v2887_v59, %v5621_v7  ;;  %v2889_v61 = vpop.f32.mrb[37].mxu0  ;;  %3292 = vmatmul.mubr.bf16.gmra.mrb[84].mxu0 %v3068_v57 }
 0x462   : > { %v2890_v62 = vadd.f32 %v2889_v61, %v5626_v10  ;;  %v2891_v63 = vpop.f32.mrb[38].mxu0 }
 0x463   : > { %3016 = vst [vmem:[%s5630_s0 + $0xa0] sm:$0xff] %v2888_v60  ;;  %v2892_v0 = vadd.f32 %v2891_v63, %v5621_v7  ;;  %v2893_v1 = vpop.f32.mrb[39].mxu0 }
 0x464   : > { %3017 = vst [vmem:[%s5630_s0 + $0xa8] sm:$0xff] %v2890_v62  ;;  %v2894_v2 = vadd.f32 %v2893_v1, %v5626_v10 }
 0x465   : > { %3018 = vst [vmem:[%s5630_s0 + $0xb0] sm:$0xff] %v2892_v0  ;;  %v3070_v3 = vpack.c.bf16 %v2892_v0, %v2888_v60 }
 0x466   : > { %3019 = vst [vmem:[%s5630_s0 + $0xb8] sm:$0xff] %v2894_v2  ;;  %v3071_v4 = vpack.c.bf16 %v2894_v2, %v2890_v62 }
 0x468   : > { %v2897_v5 = vpop.f32.mrb[40].mxu0  ;;  %3299 = vmatprep.mubr.bf16.mxu0 %v3071_v4 }
 0x469   : > { %v2898_v6 = vadd.f32 %v2897_v5, %v5621_v7  ;;  %v2899_v8 = vpop.f32.mrb[41].mxu0  ;;  %3300 = vmatmul.mubr.bf16.gmra.mrb[88].mxu0 %v3070_v3 }
 0x46a   : > { %v2900_v11 = vadd.f32 %v2899_v8, %v5626_v10  ;;  %v2901_v16 = vpop.f32.mrb[42].mxu0 }
 0x46b   : > { %3020 = vst [vmem:[%s5630_s0 + $0xc0] sm:$0xff] %v2898_v6  ;;  %v2902_v9 = vadd.f32 %v2901_v16, %v5621_v7  ;;  %v2903_v12 = vpop.f32.mrb[43].mxu0 }
 0x46c   : > { %3021 = vst [vmem:[%s5630_s0 + $0xc8] sm:$0xff] %v2900_v11  ;;  %v2904_v19 = vadd.f32 %v2903_v12, %v5626_v10 }
 0x46d   : > { %3022 = vst [vmem:[%s5630_s0 + $0xd0] sm:$0xff] %v2902_v9  ;;  %v3072_v13 = vpack.c.bf16 %v2902_v9, %v2898_v6 }
 0x46e   : > { %3023 = vst [vmem:[%s5630_s0 + $0xd8] sm:$0xff] %v2904_v19  ;;  %v3073_v21 = vpack.c.bf16 %v2904_v19, %v2900_v11 }
 0x470   : > { %v2907_v14 = vpop.f32.mrb[44].mxu0  ;;  %3307 = vmatprep.mubr.bf16.mxu0 %v3073_v21 }
 0x471   : > { %v2908_v15 = vadd.f32 %v2907_v14, %v5621_v7  ;;  %v2909_v17 = vpop.f32.mrb[45].mxu0  ;;  %3308 = vmatmul.mubr.bf16.gmra.mrb[92].mxu0 %v3072_v13 }
 0x472   : > { %v2910_v18 = vadd.f32 %v2909_v17, %v5626_v10  ;;  %v2911_v20 = vpop.f32.mrb[46].mxu0 }
 0x473   : > { %3024 = vst [vmem:[%s5630_s0 + $0xe0] sm:$0xff] %v2908_v15  ;;  %v2912_v22 = vadd.f32 %v2911_v20, %v5621_v7  ;;  %v2913_v23 = vpop.f32.mrb[47].mxu0 }
 0x474   : > { %3025 = vst [vmem:[%s5630_s0 + $0xe8] sm:$0xff] %v2910_v18  ;;  %v2914_v24 = vadd.f32 %v2913_v23, %v5626_v10 }
 0x475   : > { %3026 = vst [vmem:[%s5630_s0 + $0xf0] sm:$0xff] %v2912_v22  ;;  %v3074_v25 = vpack.c.bf16 %v2912_v22, %v2908_v15 }
 0x476   : > { %3027 = vst [vmem:[%s5630_s0 + $0xf8] sm:$0xff] %v2914_v24  ;;  %v3075_v26 = vpack.c.bf16 %v2914_v24, %v2910_v18 }
 0x478   : > { %v2917_v27 = vpop.f32.mrb[48].mxu0  ;;  %3315 = vmatprep.mubr.bf16.mxu0 %v3075_v26 }
 0x479   : > { %v2918_v28 = vadd.f32 %v2917_v27, %v5621_v7  ;;  %v2919_v29 = vpop.f32.mrb[49].mxu0  ;;  %3316 = vmatmul.mubr.bf16.gmra.mrb[96].mxu0 %v3074_v25 }
 0x47a   : > { %v2920_v30 = vadd.f32 %v2919_v29, %v5626_v10  ;;  %v2921_v31 = vpop.f32.mrb[50].mxu0 }
 0x47b   : > { %3028 = vst [vmem:[%s5630_s0 + $0x100] sm:$0xff] %v2918_v28  ;;  %v2922_v32 = vadd.f32 %v2921_v31, %v5621_v7  ;;  %v2923_v33 = vpop.f32.mrb[51].mxu0 }
 0x47c   : > { %3029 = vst [vmem:[%s5630_s0 + $0x108] sm:$0xff] %v2920_v30  ;;  %v2924_v34 = vadd.f32 %v2923_v33, %v5626_v10 }
 0x47d   : > { %3030 = vst [vmem:[%s5630_s0 + $0x110] sm:$0xff] %v2922_v32  ;;  %v3076_v35 = vpack.c.bf16 %v2922_v32, %v2918_v28 }
 0x47e   : > { %3031 = vst [vmem:[%s5630_s0 + $0x118] sm:$0xff] %v2924_v34  ;;  %v3077_v36 = vpack.c.bf16 %v2924_v34, %v2920_v30 }
 0x480   : > { %v2927_v37 = vpop.f32.mrb[52].mxu0  ;;  %3323 = vmatprep.mubr.bf16.mxu0 %v3077_v36 }
 0x481   : > { %v2928_v38 = vadd.f32 %v2927_v37, %v5621_v7  ;;  %v2929_v39 = vpop.f32.mrb[53].mxu0  ;;  %3324 = vmatmul.mubr.bf16.gmra.mrb[100].mxu0 %v3076_v35 }
 0x482   : > { %v2930_v40 = vadd.f32 %v2929_v39, %v5626_v10  ;;  %v2931_v41 = vpop.f32.mrb[54].mxu0 }
 0x483   : > { %3032 = vst [vmem:[%s5630_s0 + $0x120] sm:$0xff] %v2928_v38  ;;  %v2932_v42 = vadd.f32 %v2931_v41, %v5621_v7  ;;  %v2933_v43 = vpop.f32.mrb[55].mxu0 }
 0x484   : > { %3033 = vst [vmem:[%s5630_s0 + $0x128] sm:$0xff] %v2930_v40  ;;  %v2934_v44 = vadd.f32 %v2933_v43, %v5626_v10 }
 0x485   : > { %3034 = vst [vmem:[%s5630_s0 + $0x130] sm:$0xff] %v2932_v42  ;;  %v3078_v45 = vpack.c.bf16 %v2932_v42, %v2928_v38 }
 0x486   : > { %3035 = vst [vmem:[%s5630_s0 + $0x138] sm:$0xff] %v2934_v44  ;;  %v3079_v46 = vpack.c.bf16 %v2934_v44, %v2930_v40 }
 0x488   : > { %v2937_v47 = vpop.f32.mrb[56].mxu0  ;;  %3331 = vmatprep.mubr.bf16.mxu0 %v3079_v46 }
 0x489   : > { %v2938_v48 = vadd.f32 %v2937_v47, %v5621_v7  ;;  %v2939_v49 = vpop.f32.mrb[57].mxu0  ;;  %3332 = vmatmul.mubr.bf16.gmra.mrb[104].mxu0 %v3078_v45 }
 0x48a   : > { %v2940_v51 = vadd.f32 %v2939_v49, %v5626_v10  ;;  %v2941_v50 = vpop.f32.mrb[58].mxu0 }
 0x48b   : > { %3036 = vst [vmem:[%s5630_s0 + $0x140] sm:$0xff] %v2938_v48  ;;  %v2942_v52 = vadd.f32 %v2941_v50, %v5621_v7  ;;  %v2943_v53 = vpop.f32.mrb[59].mxu0 }
 0x48c   : > { %3037 = vst [vmem:[%s5630_s0 + $0x148] sm:$0xff] %v2940_v51  ;;  %v2944_v54 = vadd.f32 %v2943_v53, %v5626_v10 }
 0x48d   : > { %3038 = vst [vmem:[%s5630_s0 + $0x150] sm:$0xff] %v2942_v52  ;;  %v3080_v55 = vpack.c.bf16 %v2942_v52, %v2938_v48 }
 0x48e   : > { %3039 = vst [vmem:[%s5630_s0 + $0x158] sm:$0xff] %v2944_v54  ;;  %v3081_v56 = vpack.c.bf16 %v2944_v54, %v2940_v51 }
 0x490   : > { %v2947_v57 = vpop.f32.mrb[60].mxu0  ;;  %3339 = vmatprep.mubr.bf16.mxu0 %v3081_v56 }
 0x491   : > { %v2948_v58 = vadd.f32 %v2947_v57, %v5621_v7  ;;  %v2949_v59 = vpop.f32.mrb[61].mxu0  ;;  %3340 = vmatmul.mubr.bf16.gmra.mrb[108].mxu0 %v3080_v55 }
 0x492   : > { %v2950_v60 = vadd.f32 %v2949_v59, %v5626_v10  ;;  %v2951_v61 = vpop.f32.mrb[62].mxu0 }
 0x493   : > { %3040 = vst [vmem:[%s5630_s0 + $0x160] sm:$0xff] %v2948_v58  ;;  %v2952_v62 = vadd.f32 %v2951_v61, %v5621_v7  ;;  %v2953_v63 = vpop.f32.mrb[63].mxu0 }
 0x494   : > { %3041 = vst [vmem:[%s5630_s0 + $0x168] sm:$0xff] %v2950_v60  ;;  %v2954_v0 = vadd.f32 %v2953_v63, %v5626_v10 }
 0x495   : > { %3042 = vst [vmem:[%s5630_s0 + $0x170] sm:$0xff] %v2952_v62  ;;  %v3082_v1 = vpack.c.bf16 %v2952_v62, %v2948_v58 }
 0x496   : > { %3043 = vst [vmem:[%s5630_s0 + $0x178] sm:$0xff] %v2954_v0  ;;  %v3083_v2 = vpack.c.bf16 %v2954_v0, %v2950_v60 }
 0x498   : > { %v2957_v3 = vpop.f32.mrb[64].mxu0  ;;  %3347 = vmatprep.mubr.bf16.mxu0 %v3083_v2 }
 0x499   : > { %v2958_v4 = vadd.f32 %v2957_v3, %v5621_v7  ;;  %v2959_v5 = vpop.f32.mrb[65].mxu0  ;;  %3348 = vmatmul.mubr.bf16.gmra.mrb[112].mxu0 %v3082_v1 }
 0x49a   : > { %v2960_v6 = vadd.f32 %v2959_v5, %v5626_v10  ;;  %v2961_v8 = vpop.f32.mrb[66].mxu0 }
 0x49b   : > { %3044 = vst [vmem:[%s5630_s0 + $0x180] sm:$0xff] %v2958_v4  ;;  %v2962_v11 = vadd.f32 %v2961_v8, %v5621_v7  ;;  %v2963_v16 = vpop.f32.mrb[67].mxu0 }
 0x49c   : > { %3045 = vst [vmem:[%s5630_s0 + $0x188] sm:$0xff] %v2960_v6  ;;  %v2964_v9 = vadd.f32 %v2963_v16, %v5626_v10 }
 0x49d   : > { %3046 = vst [vmem:[%s5630_s0 + $0x190] sm:$0xff] %v2962_v11  ;;  %v3084_v12 = vpack.c.bf16 %v2962_v11, %v2958_v4 }
 0x49e   : > { %3047 = vst [vmem:[%s5630_s0 + $0x198] sm:$0xff] %v2964_v9  ;;  %v3085_v19 = vpack.c.bf16 %v2964_v9, %v2960_v6 }
 0x4a0   : > { %v2967_v13 = vpop.f32.mrb[128].mxu1  ;;  %3355 = vmatprep.mubr.bf16.mxu0 %v3085_v19 }
 0x4a1   : > { %v2968_v21 = vadd.f32 %v2967_v13, %v5621_v7  ;;  %v2969_v14 = vpop.f32.mrb[129].mxu1  ;;  %3356 = vmatmul.mubr.bf16.gmra.mrb[116].mxu0 %v3084_v12 }
 0x4a2   : > { %v2970_v15 = vadd.f32 %v2969_v14, %v5626_v10  ;;  %v2971_v17 = vpop.f32.mrb[130].mxu1 }
 0x4a3   : > { %3048 = vst [vmem:[%s5630_s0 + $0x1a0] sm:$0xff] %v2968_v21  ;;  %v2972_v18 = vadd.f32 %v2971_v17, %v5621_v7  ;;  %v2973_v20 = vpop.f32.mrb[131].mxu1 }
 0x4a4   : > { %3049 = vst [vmem:[%s5630_s0 + $0x1a8] sm:$0xff] %v2970_v15  ;;  %v2974_v22 = vadd.f32 %v2973_v20, %v5626_v10 }
 0x4a5   : > { %3050 = vst [vmem:[%s5630_s0 + $0x1b0] sm:$0xff] %v2972_v18  ;;  %v3086_v23 = vpack.c.bf16 %v2972_v18, %v2968_v21 }
 0x4a6   : > { %3051 = vst [vmem:[%s5630_s0 + $0x1b8] sm:$0xff] %v2974_v22  ;;  %v3087_v24 = vpack.c.bf16 %v2974_v22, %v2970_v15 }
 0x4a8   : > { %v2977_v25 = vpop.f32.mrb[132].mxu1  ;;  %3363 = vmatprep.mubr.bf16.mxu0 %v3087_v24 }
 0x4a9   : > { %v2978_v26 = vadd.f32 %v2977_v25, %v5621_v7  ;;  %v2979_v27 = vpop.f32.mrb[133].mxu1  ;;  %3364 = vmatmul.mubr.bf16.gmra.mrb[120].mxu0 %v3086_v23 }
 0x4aa   : > { %v2980_v28 = vadd.f32 %v2979_v27, %v5626_v10  ;;  %v2981_v29 = vpop.f32.mrb[134].mxu1 }
 0x4ab   : > { %3052 = vst [vmem:[%s5630_s0 + $0x1c0] sm:$0xff] %v2978_v26  ;;  %v2982_v30 = vadd.f32 %v2981_v29, %v5621_v7  ;;  %v2983_v31 = vpop.f32.mrb[135].mxu1 }
 0x4ac   : > { %3053 = vst [vmem:[%s5630_s0 + $0x1c8] sm:$0xff] %v2980_v28  ;;  %v2984_v32 = vadd.f32 %v2983_v31, %v5626_v10 }
 0x4ad   : > { %3054 = vst [vmem:[%s5630_s0 + $0x1d0] sm:$0xff] %v2982_v30  ;;  %v3088_v33 = vpack.c.bf16 %v2982_v30, %v2978_v26 }
 0x4ae   : > { %3055 = vst [vmem:[%s5630_s0 + $0x1d8] sm:$0xff] %v2984_v32  ;;  %v3089_v34 = vpack.c.bf16 %v2984_v32, %v2980_v28 }
 0x4b0   : > { %v2987_v35 = vpop.f32.mrb[136].mxu1  ;;  %3371 = vmatprep.mubr.bf16.mxu0 %v3089_v34 }
 0x4b1   : > { %v2988_v36 = vadd.f32 %v2987_v35, %v5621_v7  ;;  %v2989_v37 = vpop.f32.mrb[137].mxu1  ;;  %3372 = vmatmul.mubr.bf16.gmra.mrb[124].mxu0 %v3088_v33 }
 0x4b2   : > { %v2990_v38 = vadd.f32 %v2989_v37, %v5626_v10  ;;  %v2991_v39 = vpop.f32.mrb[138].mxu1 }
 0x4b3   : > { %3056 = vst [vmem:[%s5630_s0 + $0x1e0] sm:$0xff] %v2988_v36  ;;  %v2992_v40 = vadd.f32 %v2991_v39, %v5621_v7  ;;  %v2993_v41 = vpop.f32.mrb[139].mxu1 }
 0x4b4   : > { %3057 = vst [vmem:[%s5630_s0 + $0x1e8] sm:$0xff] %v2990_v38  ;;  %v2994_v42 = vadd.f32 %v2993_v41, %v5626_v10  ;;  %v5770_v10 = vld [vmem:[%s5897_s11] ss:$0 sm:$0xff] }
 0x4b5   : > { %3058 = vst [vmem:[%s5630_s0 + $0x1f0] sm:$0xff] %v2992_v40  ;;  %v3090_v43 = vpack.c.bf16 %v2992_v40, %v2988_v36 }
 0x4b6   : > { %3059 = vst [vmem:[%s5630_s0 + $0x1f8] sm:$0xff] %v2994_v42  ;;  %v3091_v44 = vpack.c.bf16 %v2994_v42, %v2990_v38  ;;  %s4448_s0 = sshll.u32 %s4509_s14, 4  ;;  %s4449_s0 = int_to_ptr.vmem [resolvable:$false] %s4448_s0 }
 0x4b7   : > { %s4450_s22 = scalar_lea.vmem %s4449_s0, 16384  ;;  %p4451_p0 = scmp.lt.s32.totalorder %s5765_s30, %s4449_s0 }
 0x4b8   : > { %3379 = vmatprep.mubr.bf16.mxu0 %v3091_v44  ;;  %p4452_p1 = scmp.lt.s32.totalorder %s4450_s22, %s4444_s27 }
 0x4b9   : > { %3380 = vmatmul.mubr.bf16.gmra.mrb[128].mxu0 %v3090_v43 }
 0x4ba   : > { %p4453_p2 = por %p4452_p1, %p4451_p0 }
 0x4bc   : > { %p4454_p3 = pnand %p4453_p2, %p4447_p13 }
 0x514   : > { %v3834_v7 = vpop.f32.mrb[68].mxu0 }
 0x515   : > { %v3835_v45 = vpop.f32.mrb[69].mxu0 }
 0x516   : > { %v3836_v46 = vadd.f32 %v3835_v45, %v3834_v7  ;;  %v3837_v47 = vpop.f32.mrb[70].mxu0 }
 0x517   : > { %4457 = shalt.err (!%p4454_p3)
}
 0x518   : > { %s4458_s24 = scalar_lea.hbm %s5763_s17, 8192  ;;  %s4462_s20 = scalar_lea.hbm %s5899_s13, 16384 }
 0x519   : > { %p4459_p4 = scmp.ne.s32.totalorder %s5763_s17, %s4458_s24  ;;  %p4463_p9 = scmp.lt.u32.totalorder %s5763_s17, %s5899_s13 }
 0x51a   : > { %p4464_p10 = scmp.lt.u32.totalorder %s4462_s20, %s4458_s24  ;;  %p4466_p12 = scmp.lt.u32.totalorder %s4458_s24, %s5763_s17 }
 0x51b   : > { %p4460_p7 = pnand %p4459_p4, %p4620_p5 }
 0x51c   : > { %p4465_p11 = por %p4464_p10, %p4463_p9 }
 0x51d   : > { %p4461_p8 = pneg %p4460_p7 }
 0x51e   : > { %p4467_p13 = por %p4466_p12, %p4465_p11 }
 0x520   : > { %p4468_p0 = pnand %p4467_p13, %p4461_p8 }
 0x522   : > { %4471 = shalt.err (!%p4468_p0)
}
 0x523   : > { %s4510_s27 = smov 256   ;;  %s4511_s0 = smov 16   ;;  %v3838_v48 = vpop.f32.mrb[71].mxu0  ;;  %v3262_v49 = vadd.f32 %v3836_v46, %v5770_v10 }
 0x524   : > { %4074 = dma.vmem_to_hbm [thread:$0]  (%p4620_p5), %s5765_s30, 8192, %s5763_s17, %s5774_s29, %s4510_s27, %s4510_s27, %s4511_s0   ;;  %v3839_v51 = vadd.f32 %v3838_v48, %v3837_v47  ;;  %v3840_v52 = vpop.f32.mrb[72].mxu0 }
 0x525   : > { %s5911_s22 = sshll.u32 %s4659_s16, 8  ;;  %v3841_v53 = vpop.f32.mrb[73].mxu0 }
 0x526   : > { %s5803_s21 = scalar_lea.vmem %s5898_s12, %s5911_s22  ;;  %v3265_v50 = vadd.f32 %v3839_v51, %v5770_v10  ;;  %v3842_v54 = vadd.f32 %v3841_v53, %v3840_v52  ;;  %v3843_v55 = vpop.f32.mrb[74].mxu0 }
 0x527   : > { %3388 = vst [vmem:[%s5803_s21] sm:$0xff] %v3262_v49  ;;  %v3844_v56 = vpop.f32.mrb[75].mxu0 }
 0x528   : > { %3389 = vst [vmem:[%s5803_s21 + $0x8] sm:$0xff] %v3265_v50  ;;  %v3270_v57 = vadd.f32 %v3842_v54, %v5770_v10  ;;  %v3845_v58 = vadd.f32 %v3844_v56, %v3843_v55  ;;  %v3846_v60 = vpop.f32.mrb[76].mxu0 }
 0x529   : > { %v3847_v61 = vpop.f32.mrb[77].mxu0 }
 0x52a   : > { %3390 = vst [vmem:[%s5803_s21 + $0x10] sm:$0xff] %v3270_v57  ;;  %v3273_v59 = vadd.f32 %v3845_v58, %v5770_v10  ;;  %v3848_v62 = vadd.f32 %v3847_v61, %v3846_v60  ;;  %v3849_v63 = vpop.f32.mrb[78].mxu0 }
 0x52b   : > { %v3850_v0 = vpop.f32.mrb[79].mxu0 }
 0x52c   : > { %3391 = vst [vmem:[%s5803_s21 + $0x18] sm:$0xff] %v3273_v59  ;;  %v3278_v1 = vadd.f32 %v3848_v62, %v5770_v10  ;;  %v3851_v2 = vadd.f32 %v3850_v0, %v3849_v63  ;;  %v3852_v4 = vpop.f32.mrb[80].mxu0 }
 0x52d   : > { %v3853_v5 = vpop.f32.mrb[81].mxu0 }
 0x52e   : > { %3392 = vst [vmem:[%s5803_s21 + $0x20] sm:$0xff] %v3278_v1  ;;  %v3281_v3 = vadd.f32 %v3851_v2, %v5770_v10  ;;  %v3854_v6 = vadd.f32 %v3853_v5, %v3852_v4  ;;  %v3855_v8 = vpop.f32.mrb[82].mxu0 }
 0x52f   : > { %v3856_v11 = vpop.f32.mrb[83].mxu0 }
 0x530   : > { %3393 = vst [vmem:[%s5803_s21 + $0x28] sm:$0xff] %v3281_v3  ;;  %v3286_v16 = vadd.f32 %v3854_v6, %v5770_v10  ;;  %v3857_v9 = vadd.f32 %v3856_v11, %v3855_v8 }
 0x532   : > { %3394 = vst [vmem:[%s5803_s21 + $0x30] sm:$0xff] %v3286_v16  ;;  %v3289_v12 = vadd.f32 %v3857_v9, %v5770_v10 }
 0x534   : > { %3395 = vst [vmem:[%s5803_s21 + $0x38] sm:$0xff] %v3289_v12  ;;  %v3858_v19 = vpop.f32.mrb[84].mxu0 }
 0x535   : > { %v3859_v13 = vpop.f32.mrb[85].mxu0 }
 0x536   : > { %v3860_v21 = vadd.f32 %v3859_v13, %v3858_v19  ;;  %v3861_v14 = vpop.f32.mrb[86].mxu0 }
 0x537   : > { %v3862_v15 = vpop.f32.mrb[87].mxu0 }
 0x538   : > { %v3294_v17 = vadd.f32 %v3860_v21, %v5770_v10  ;;  %v3863_v18 = vadd.f32 %v3862_v15, %v3861_v14 }
 0x53a   : > { %3396 = vst [vmem:[%s5803_s21 + $0x40] sm:$0xff] %v3294_v17  ;;  %v3297_v20 = vadd.f32 %v3863_v18, %v5770_v10 }
 0x53c   : > { %3397 = vst [vmem:[%s5803_s21 + $0x48] sm:$0xff] %v3297_v20  ;;  %v3864_v22 = vpop.f32.mrb[88].mxu0 }
 0x53d   : > { %v3865_v23 = vpop.f32.mrb[89].mxu0 }
 0x53e   : > { %v3866_v24 = vadd.f32 %v3865_v23, %v3864_v22  ;;  %v3867_v25 = vpop.f32.mrb[90].mxu0 }
 0x53f   : > { %v3868_v26 = vpop.f32.mrb[91].mxu0 }
 0x540   : > { %v3302_v27 = vadd.f32 %v3866_v24, %v5770_v10  ;;  %v3869_v28 = vadd.f32 %v3868_v26, %v3867_v25 }
 0x542   : > { %3398 = vst [vmem:[%s5803_s21 + $0x50] sm:$0xff] %v3302_v27  ;;  %v3305_v29 = vadd.f32 %v3869_v28, %v5770_v10 }
 0x544   : > { %3399 = vst [vmem:[%s5803_s21 + $0x58] sm:$0xff] %v3305_v29  ;;  %v3870_v30 = vpop.f32.mrb[92].mxu0 }
 0x545   : > { %v3871_v31 = vpop.f32.mrb[93].mxu0 }
 0x546   : > { %v3872_v32 = vadd.f32 %v3871_v31, %v3870_v30  ;;  %v3873_v33 = vpop.f32.mrb[94].mxu0 }
 0x547   : > { %v3874_v34 = vpop.f32.mrb[95].mxu0 }
 0x548   : > { %v3310_v35 = vadd.f32 %v3872_v32, %v5770_v10  ;;  %v3875_v36 = vadd.f32 %v3874_v34, %v3873_v33 }
 0x54a   : > { %3400 = vst [vmem:[%s5803_s21 + $0x60] sm:$0xff] %v3310_v35  ;;  %v3313_v37 = vadd.f32 %v3875_v36, %v5770_v10 }
 0x54c   : > { %3401 = vst [vmem:[%s5803_s21 + $0x68] sm:$0xff] %v3313_v37  ;;  %v3876_v38 = vpop.f32.mrb[96].mxu0 }
 0x54d   : > { %v3877_v39 = vpop.f32.mrb[97].mxu0 }
 0x54e   : > { %v3878_v40 = vadd.f32 %v3877_v39, %v3876_v38  ;;  %v3879_v41 = vpop.f32.mrb[98].mxu0 }
 0x54f   : > { %v3880_v42 = vpop.f32.mrb[99].mxu0 }
 0x550   : > { %v3318_v43 = vadd.f32 %v3878_v40, %v5770_v10  ;;  %v3881_v44 = vadd.f32 %v3880_v42, %v3879_v41 }
 0x552   : > { %3402 = vst [vmem:[%s5803_s21 + $0x70] sm:$0xff] %v3318_v43  ;;  %v3321_v7 = vadd.f32 %v3881_v44, %v5770_v10 }
 0x554   : > { %3403 = vst [vmem:[%s5803_s21 + $0x78] sm:$0xff] %v3321_v7  ;;  %v3882_v45 = vpop.f32.mrb[100].mxu0 }
 0x555   : > { %v3883_v46 = vpop.f32.mrb[101].mxu0 }
 0x556   : > { %v3884_v47 = vadd.f32 %v3883_v46, %v3882_v45  ;;  %v3885_v48 = vpop.f32.mrb[102].mxu0 }
 0x557   : > { %v3886_v49 = vpop.f32.mrb[103].mxu0 }
 0x558   : > { %v3326_v51 = vadd.f32 %v3884_v47, %v5770_v10  ;;  %v3887_v50 = vadd.f32 %v3886_v49, %v3885_v48 }
 0x55a   : > { %3404 = vst [vmem:[%s5803_s21 + $0x80] sm:$0xff] %v3326_v51  ;;  %v3329_v52 = vadd.f32 %v3887_v50, %v5770_v10 }
 0x55c   : > { %3405 = vst [vmem:[%s5803_s21 + $0x88] sm:$0xff] %v3329_v52  ;;  %v3888_v53 = vpop.f32.mrb[104].mxu0 }
 0x55d   : > { %v3889_v54 = vpop.f32.mrb[105].mxu0 }
 0x55e   : > { %v3890_v55 = vadd.f32 %v3889_v54, %v3888_v53  ;;  %v3891_v56 = vpop.f32.mrb[106].mxu0 }
 0x55f   : > { %v3892_v57 = vpop.f32.mrb[107].mxu0 }
 0x560   : > { %v3334_v58 = vadd.f32 %v3890_v55, %v5770_v10  ;;  %v3893_v59 = vadd.f32 %v3892_v57, %v3891_v56 }
 0x562   : > { %3406 = vst [vmem:[%s5803_s21 + $0x90] sm:$0xff] %v3334_v58  ;;  %v3337_v60 = vadd.f32 %v3893_v59, %v5770_v10 }
 0x564   : > { %3407 = vst [vmem:[%s5803_s21 + $0x98] sm:$0xff] %v3337_v60  ;;  %v3894_v61 = vpop.f32.mrb[108].mxu0 }
 0x565   : > { %v3895_v62 = vpop.f32.mrb[109].mxu0 }
 0x566   : > { %v3896_v63 = vadd.f32 %v3895_v62, %v3894_v61  ;;  %v3897_v0 = vpop.f32.mrb[110].mxu0 }
 0x567   : > { %v3898_v1 = vpop.f32.mrb[111].mxu0 }
 0x568   : > { %v3342_v2 = vadd.f32 %v3896_v63, %v5770_v10  ;;  %v3899_v3 = vadd.f32 %v3898_v1, %v3897_v0 }
 0x56a   : > { %3408 = vst [vmem:[%s5803_s21 + $0xa0] sm:$0xff] %v3342_v2  ;;  %v3345_v4 = vadd.f32 %v3899_v3, %v5770_v10 }
 0x56c   : > { %3409 = vst [vmem:[%s5803_s21 + $0xa8] sm:$0xff] %v3345_v4  ;;  %v3900_v5 = vpop.f32.mrb[112].mxu0 }
 0x56d   : > { %v3901_v6 = vpop.f32.mrb[113].mxu0 }
 0x56e   : > { %v3902_v8 = vadd.f32 %v3901_v6, %v3900_v5  ;;  %v3903_v11 = vpop.f32.mrb[114].mxu0 }
 0x56f   : > { %v3904_v16 = vpop.f32.mrb[115].mxu0 }
 0x570   : > { %v3350_v9 = vadd.f32 %v3902_v8, %v5770_v10  ;;  %v3905_v12 = vadd.f32 %v3904_v16, %v3903_v11 }
 0x572   : > { %3410 = vst [vmem:[%s5803_s21 + $0xb0] sm:$0xff] %v3350_v9  ;;  %v3353_v19 = vadd.f32 %v3905_v12, %v5770_v10 }
 0x574   : > { %3411 = vst [vmem:[%s5803_s21 + $0xb8] sm:$0xff] %v3353_v19  ;;  %v3906_v13 = vpop.f32.mrb[116].mxu0 }
 0x575   : > { %v3907_v21 = vpop.f32.mrb[117].mxu0 }
 0x576   : > { %v3908_v14 = vadd.f32 %v3907_v21, %v3906_v13  ;;  %v3909_v15 = vpop.f32.mrb[118].mxu0 }
 0x577   : > { %v3910_v17 = vpop.f32.mrb[119].mxu0 }
 0x578   : > { %v3358_v18 = vadd.f32 %v3908_v14, %v5770_v10  ;;  %v3911_v20 = vadd.f32 %v3910_v17, %v3909_v15 }
 0x57a   : > { %3412 = vst [vmem:[%s5803_s21 + $0xc0] sm:$0xff] %v3358_v18  ;;  %v3361_v22 = vadd.f32 %v3911_v20, %v5770_v10 }
 0x57c   : > { %3413 = vst [vmem:[%s5803_s21 + $0xc8] sm:$0xff] %v3361_v22  ;;  %v3912_v23 = vpop.f32.mrb[120].mxu0 }
 0x57d   : > { %v3913_v24 = vpop.f32.mrb[121].mxu0 }
 0x57e   : > { %v3914_v25 = vadd.f32 %v3913_v24, %v3912_v23  ;;  %v3915_v26 = vpop.f32.mrb[122].mxu0 }
 0x57f   : > { %v3916_v27 = vpop.f32.mrb[123].mxu0 }
 0x580   : > { %v3366_v28 = vadd.f32 %v3914_v25, %v5770_v10  ;;  %v3917_v29 = vadd.f32 %v3916_v27, %v3915_v26 }
 0x582   : > { %3414 = vst [vmem:[%s5803_s21 + $0xd0] sm:$0xff] %v3366_v28  ;;  %v3369_v30 = vadd.f32 %v3917_v29, %v5770_v10 }
 0x584   : > { %3415 = vst [vmem:[%s5803_s21 + $0xd8] sm:$0xff] %v3369_v30  ;;  %v3918_v31 = vpop.f32.mrb[124].mxu0 }
 0x585   : > { %v3919_v32 = vpop.f32.mrb[125].mxu0 }
 0x586   : > { %v3920_v33 = vadd.f32 %v3919_v32, %v3918_v31  ;;  %v3921_v34 = vpop.f32.mrb[126].mxu0 }
 0x587   : > { %v3922_v35 = vpop.f32.mrb[127].mxu0 }
 0x588   : > { %v3374_v36 = vadd.f32 %v3920_v33, %v5770_v10  ;;  %v3923_v37 = vadd.f32 %v3922_v35, %v3921_v34 }
 0x58a   : > { %3416 = vst [vmem:[%s5803_s21 + $0xe0] sm:$0xff] %v3374_v36  ;;  %v3377_v38 = vadd.f32 %v3923_v37, %v5770_v10 }
 0x58c   : > { %3417 = vst [vmem:[%s5803_s21 + $0xe8] sm:$0xff] %v3377_v38  ;;  %v3924_v39 = vpop.f32.mrb[128].mxu0 }
 0x58d   : > { %v3925_v40 = vpop.f32.mrb[129].mxu0 }
 0x58e   : > { %v3926_v41 = vadd.f32 %v3925_v40, %v3924_v39  ;;  %v3927_v42 = vpop.f32.mrb[130].mxu0 }
 0x58f   : > { %v3928_v43 = vpop.f32.mrb[131].mxu0 }
 0x590   : > { %v3382_v44 = vadd.f32 %v3926_v41, %v5770_v10  ;;  %v3929_v7 = vadd.f32 %v3928_v43, %v3927_v42 }
 0x592   : > { %3418 = vst [vmem:[%s5803_s21 + $0xf0] sm:$0xff] %v3382_v44  ;;  %v3385_v45 = vadd.f32 %v3929_v7, %v5770_v10 }
 0x594   : > { %3419 = vst [vmem:[%s5803_s21 + $0xf8] sm:$0xff] %v3385_v45 }
 0x595 PF: > { %p4080_p5 = scmp.ge.s32.totalorder %s4506_s28, 2  ;;  %s3465_s18 = sand.u32 1, %s4494_s25  }
 0x596   : > { %s3466_s16 = scalar_lea.sflag [#allocation3], %s3465_s18 }
 0x597   : > { %p4077_p1 = pnand %p4080_p5, %p4624_p6 }
 0x599   : > { %4489 = dma.done.wait (!%p4077_p1), %s3466_s16, 8192  }
 0x59a   : > { %4491 = vsyncadd (!%p4077_p1), %s3466_s16, 4294959104  ;;  %s5912_s28 = sld [smem:[#allocation6_spill]]  ;;  %s5913_s30 = sld [smem:[#allocation5_spill]] }
 0x59b   : > { %s5914_s27 = sld [smem:[#allocation7_spill]]  ;;  %s5915_s25 = smov %s4498_s26 }
 0x5a0   : > { %p24_p2 = scmp.ge.s32.totalorder %s5912_s28, 4   ;;  %s5916_s26 = smov %s5913_s30 }
 0x5a2   :  { %26 = sbr.rel (!%p24_p2) target bundleno = 5 (0x5), region = 118 }
 0x5a9   :  { %3471 = vsyncpa [#allocation3], 1 }
 0x5aa   :  { %3473 = vsyncpa [#allocation3 + $0x1], 1 }

</bundles_post_ra>
